<compile_context>
chip_gen: v5e
topology: v5e:2x2
jax: 0.10.0
libtpu: 0.0.40
codegen_flags: <defaults>
</compile_context>

<pallas_src>
import math
import jax
import jax.numpy as jnp
from jax.experimental import pallas as pl
from jax.experimental.pallas import tpu as pltpu

# ---- small synthetic BERT config (real model: H=768, L=12, NH=12, I=3072) ----
B = 2          # batch
S = 8          # sequence length
H = 128        # hidden size
NH = 2         # attention heads
D = H // NH    # head dim
I = 256        # FFN intermediate size
L = 2          # encoder layers
VOCAB = 100
TYPE_VOCAB = 2
EPS = 1e-12    # BERT layer_norm_eps
LANES = 128    # lane-padded width of the 1-unit classifier output


def _layernorm(x, g, b):
    mu = jnp.mean(x, axis=-1, keepdims=True)
    var = jnp.mean((x - mu) ** 2, axis=-1, keepdims=True)
    return (x - mu) * jax.lax.rsqrt(var + EPS) * g + b


def _bf16(x):
    return x.astype(jnp.bfloat16)


# ---------------------------------------------------------------------------
# Fused BERT kernel: grid=(L,) over layers.
#   step 0        : embedding LayerNorm (prologue)
#   every step    : one encoder layer (QKV, attention, out-proj, LN, FFN, LN)
#   last step     : BertPooler + classification head (epilogue), writes logits
# x is carried across layers in a VMEM scratch; layer weights are streamed per step.
# ---------------------------------------------------------------------------
def bert_kernel(x_emb_ref, mask_ref, eg_ref, eb_ref,
                wqkv_ref, bqkv_ref, wo_ref, bo_ref, ln1g_ref, ln1b_ref,
                wi_ref, bi_ref, wf_ref, bf_ref, ln2g_ref, ln2b_ref,
                pw_ref, pb_ref, cw_ref, cb_ref,
                out_ref, x_vmem):
    l = pl.program_id(0)

    @pl.when(l == 0)
    def _():
        # fused embedding LayerNorm
        x_vmem[...] = _layernorm(x_emb_ref[...], eg_ref[...], eb_ref[...])

    x = x_vmem[...]                                                    # (B*S, H) f32
    x_bf = _bf16(x)

    # --- self-attention: fused QKV projection (single MXU matmul, bf16 operands) ---
    qkv = jnp.dot(x_bf, wqkv_ref[0],
                  preferred_element_type=jnp.float32) + bqkv_ref[0]    # (B*S, 3H) f32
    q = qkv[:, 0 * H:1 * H]
    k = qkv[:, 1 * H:2 * H]
    v = qkv[:, 2 * H:3 * H]

    bias = mask_ref[...]                                               # (B, 1, S) additive
    scale = 1.0 / math.sqrt(D)

    # Batched (over B) attention per head; head contexts stay in registers and are
    # concatenated lane-dense before the output projection (no masked 64-lane stores).
    # TODO(synk): at real NH=12 fold the head axis into the einsum batch dim as well.
    heads = []
    for h in range(NH):
        cs = slice(h * D, (h + 1) * D)
        qh = _bf16(q[:, cs]).reshape(B, S, D)
        kh = _bf16(k[:, cs]).reshape(B, S, D)
        vh = _bf16(v[:, cs]).reshape(B, S, D)
        s = jnp.einsum("bqd,bkd->bqk", qh, kh,
                       preferred_element_type=jnp.float32) * scale + bias
        s = s - jnp.max(s, axis=-1, keepdims=True)
        p = jnp.exp(s)
        p = p * pl.reciprocal(jnp.sum(p, axis=-1, keepdims=True), approx=True)
        ch = jnp.einsum("bqk,bkd->bqd", _bf16(p), vh,
                        preferred_element_type=jnp.float32)            # (B, S, D) f32
        heads.append(ch.reshape(B * S, D))
    ctx = jnp.concatenate(heads, axis=-1)                              # (B*S, H) lane-dense

    attn = jnp.dot(_bf16(ctx), wo_ref[0],
                   preferred_element_type=jnp.float32) + bo_ref[0]
    h1 = _layernorm(attn + x, ln1g_ref[0], ln1b_ref[0])

    # --- FFN ---
    # TODO(synk): HF BERT default act is exact (erf) gelu; tanh-approx gelu used since
    # erf has no guaranteed Mosaic lowering.
    ff = jax.nn.gelu(
        jnp.dot(_bf16(h1), wi_ref[0],
                preferred_element_type=jnp.float32) + bi_ref[0],
        approximate=True)
    ff2 = jnp.dot(_bf16(ff), wf_ref[0],
                  preferred_element_type=jnp.float32) + bf_ref[0]
    x_new = _layernorm(ff2 + h1, ln2g_ref[0], ln2b_ref[0])
    x_vmem[...] = x_new                                                # carried to layer l+1

    @pl.when(l == pl.num_programs(0) - 1)
    def _():
        # fused epilogue: BertPooler + (Dropout -> Linear(H,1) -> Tanh) head.
        cls = jnp.concatenate(
            [x_new[b * S:b * S + 1, :] for b in range(B)], axis=0)     # (B, H) cls tokens
        pooled = jnp.tanh(
            jnp.dot(_bf16(cls), pw_ref[...],
                    preferred_element_type=jnp.float32) + pb_ref[...])
        out_ref[...] = jnp.tanh(
            jnp.dot(_bf16(pooled), cw_ref[...],
                    preferred_element_type=jnp.float32) + cb_ref[...])  # (B, 128), col 0 real


@jax.jit
def bert_encoder_call(x_emb, add_mask, p):
    const2 = lambda l: (0, 0)
    const3 = lambda l: (0, 0, 0)
    layer3 = lambda l: (l, 0, 0)
    in_specs = [
        pl.BlockSpec((B * S, H), const2),        # embeddings (pre-LN)
        pl.BlockSpec((B, 1, S), const3),         # additive attention mask
        pl.BlockSpec((1, H), const2),            # emb LN gamma
        pl.BlockSpec((1, H), const2),            # emb LN beta
        pl.BlockSpec((1, H, 3 * H), layer3),     # Wqkv (bf16)
        pl.BlockSpec((1, 1, 3 * H), layer3),     # bqkv
        pl.BlockSpec((1, H, H), layer3),         # Wo (bf16)
        pl.BlockSpec((1, 1, H), layer3),         # bo
        pl.BlockSpec((1, 1, H), layer3),         # LN1 gamma
        pl.BlockSpec((1, 1, H), layer3),         # LN1 beta
        pl.BlockSpec((1, H, I), layer3),         # Wi (bf16)
        pl.BlockSpec((1, 1, I), layer3),         # bi
        pl.BlockSpec((1, I, H), layer3),         # Wf (bf16)
        pl.BlockSpec((1, 1, H), layer3),         # bf
        pl.BlockSpec((1, 1, H), layer3),         # LN2 gamma
        pl.BlockSpec((1, 1, H), layer3),         # LN2 beta
        pl.BlockSpec((H, H), const2),            # pooler W (bf16)
        pl.BlockSpec((1, H), const2),            # pooler b
        pl.BlockSpec((H, LANES), const2),        # classifier W, lane-padded (bf16)
        pl.BlockSpec((1, LANES), const2),        # classifier b, lane-padded
    ]
    return pl.pallas_call(
        bert_kernel,
        out_shape=jax.ShapeDtypeStruct((B, LANES), jnp.float32),
        grid=(L,),
        in_specs=in_specs,
        out_specs=pl.BlockSpec((B, LANES), const2),
        scratch_shapes=[pltpu.VMEM((B * S, H), jnp.float32)],
        compiler_params=pltpu.CompilerParams(
            # layer axis carries x through the VMEM scratch -> must be sequential
            dimension_semantics=("arbitrary",),
            vmem_limit_bytes=32 * 1024 * 1024),
    )(x_emb, add_mask,
      p["emb_ln_g"], p["emb_ln_b"],
      p["wqkv"], p["bqkv"], p["wo"], p["bo"], p["ln1g"], p["ln1b"],
      p["wi"], p["bi"], p["wf"], p["bf"], p["ln2g"], p["ln2b"],
      p["pooler_w"], p["pooler_b"], p["cls_w"], p["cls_b"])


# ---------------------------------------------------------------------------
# Parameter init (stacked per-layer weights; bf16 matmul operands, f32 biases/LN)
# ---------------------------------------------------------------------------
def build_params(key):
    keys = iter(jax.random.split(key, 64))

    def nrm(shape):
        return jax.random.normal(next(keys), shape, jnp.float32) * 0.02

    wq, wk, wv = nrm((L, H, H)), nrm((L, H, H)), nrm((L, H, H))
    cls_w = jnp.zeros((H, LANES), jnp.float32).at[:, 0:1].set(nrm((H, 1)))
    cls_b = jnp.zeros((1, LANES), jnp.float32).at[:, 0:1].set(nrm((1, 1)))
    return dict(
        word_emb=nrm((VOCAB, H)),
        pos_emb=nrm((S, H)),
        type_emb=nrm((TYPE_VOCAB, H)),
        emb_ln_g=jnp.ones((1, H), jnp.float32),
        emb_ln_b=jnp.zeros((1, H), jnp.float32),
        # stacked per-layer weights
        wqkv=_bf16(jnp.concatenate([wq, wk, wv], axis=-1)),      # (L, H, 3H)
        bqkv=nrm((L, 1, 3 * H)),
        wo=_bf16(nrm((L, H, H))),
        bo=nrm((L, 1, H)),
        ln1g=jnp.ones((L, 1, H), jnp.float32),
        ln1b=jnp.zeros((L, 1, H), jnp.float32),
        wi=_bf16(nrm((L, H, I))),
        bi=nrm((L, 1, I)),
        wf=_bf16(nrm((L, I, H))),
        bf=nrm((L, 1, H)),
        ln2g=jnp.ones((L, 1, H), jnp.float32),
        ln2b=jnp.zeros((L, 1, H), jnp.float32),
        pooler_w=_bf16(nrm((H, H))),
        pooler_b=nrm((1, H)),
        cls_w=_bf16(cls_w),                                      # Linear(H,1) lane-padded
        cls_b=cls_b,
    )


# ---------------------------------------------------------------------------
# Full forward (embedding gathers are glue, done in plain JAX)
# ---------------------------------------------------------------------------
def forward(params, input_ids, token_type_ids, attention_mask):
    emb = (jnp.take(params["word_emb"], input_ids, axis=0)
           + params["pos_emb"][None, :, :]
           + jnp.take(params["type_emb"], token_type_ids, axis=0))     # (B, S, H)
    x = emb.reshape(B * S, H)
    add_mask = ((1.0 - attention_mask.astype(jnp.float32)) * -10000.0).reshape(B, 1, S)
    logits = bert_encoder_call(x, add_mask, params)                    # (B, 128)
    return logits[:, 0]                                                # squeeze(1) -> (B,)


# Pure-JAX reference (mirrors the kernel's bf16 casting; exact softmax division).
def forward_reference(params, input_ids, token_type_ids, attention_mask):
    emb = (jnp.take(params["word_emb"], input_ids, axis=0)
           + params["pos_emb"][None, :, :]
           + jnp.take(params["type_emb"], token_type_ids, axis=0))
    x = _layernorm(emb.reshape(B * S, H), params["emb_ln_g"], params["emb_ln_b"])
    bias = ((1.0 - attention_mask.astype(jnp.float32)) * -10000.0).reshape(B, 1, S)
    for l in range(L):
        x_bf = _bf16(x)
        qkv = jnp.dot(x_bf, params["wqkv"][l],
                      preferred_element_type=jnp.float32) + params["bqkv"][l]
        q, k, v = qkv[:, :H], qkv[:, H:2 * H], qkv[:, 2 * H:]
        heads = []
        for h in range(NH):
            cs = slice(h * D, (h + 1) * D)
            qh = _bf16(q[:, cs]).reshape(B, S, D)
            kh = _bf16(k[:, cs]).reshape(B, S, D)
            vh = _bf16(v[:, cs]).reshape(B, S, D)
            s = jnp.einsum("bqd,bkd->bqk", qh, kh,
                           preferred_element_type=jnp.float32) / math.sqrt(D) + bias
            p = jax.nn.softmax(s, axis=-1)
            ch = jnp.einsum("bqk,bkd->bqd", _bf16(p), vh,
                            preferred_element_type=jnp.float32)
            heads.append(ch.reshape(B * S, D))
        ctx = jnp.concatenate(heads, axis=-1)
        attn = jnp.dot(_bf16(ctx), params["wo"][l],
                       preferred_element_type=jnp.float32) + params["bo"][l]
        h1 = _layernorm(attn + x, params["ln1g"][l], params["ln1b"][l])
        ff = jax.nn.gelu(jnp.dot(_bf16(h1), params["wi"][l],
                                 preferred_element_type=jnp.float32) + params["bi"][l],
                         approximate=True)
        ff2 = jnp.dot(_bf16(ff), params["wf"][l],
                      preferred_element_type=jnp.float32) + params["bf"][l]
        x = _layernorm(ff2 + h1, params["ln2g"][l], params["ln2b"][l])
    cls = x.reshape(B, S, H)[:, 0, :]
    pooled = jnp.tanh(jnp.dot(_bf16(cls), params["pooler_w"],
                              preferred_element_type=jnp.float32) + params["pooler_b"])
    logit = jnp.tanh(jnp.dot(_bf16(pooled), params["cls_w"],
                             preferred_element_type=jnp.float32) + params["cls_b"])
    return logit[:, 0]


if __name__ == "__main__":
    key = jax.random.PRNGKey(0)
    pkey, ikey = jax.random.split(key)
    params = build_params(pkey)

    input_ids = jax.random.randint(ikey, (B, S), 0, VOCAB, dtype=jnp.int32)
    token_type_ids = jnp.zeros((B, S), jnp.int32)
    attention_mask = jnp.ones((B, S), jnp.float32).at[1, 6:].set(0.0)  # pad tail of sample 1

    out = forward(params, input_ids, token_type_ids, attention_mask)
    jax.block_until_ready(out)
    assert out.shape == (B,) and out.dtype == jnp.float32

    ref = forward_reference(params, input_ids, token_type_ids, attention_mask)
    assert jnp.max(jnp.abs(out - ref)) < 2e-2, (out, ref)
    print("KERNEL_OK")
</pallas_src>

<mosaic_0001>
module attributes {stable_mosaic.version = 11 : i64} {
  func.func @bert_kernel(%arg0: i32, %arg1: memref<16x128xf32, #tpu.memory_space<vmem>>, %arg2: memref<2x1x8xf32, #tpu.memory_space<vmem>>, %arg3: memref<1x128xf32, #tpu.memory_space<vmem>>, %arg4: memref<1x128xf32, #tpu.memory_space<vmem>>, %arg5: memref<1x128x384xbf16, #tpu.memory_space<vmem>>, %arg6: memref<1x1x384xf32, #tpu.memory_space<vmem>>, %arg7: memref<1x128x128xbf16, #tpu.memory_space<vmem>>, %arg8: memref<1x1x128xf32, #tpu.memory_space<vmem>>, %arg9: memref<1x1x128xf32, #tpu.memory_space<vmem>>, %arg10: memref<1x1x128xf32, #tpu.memory_space<vmem>>, %arg11: memref<1x128x256xbf16, #tpu.memory_space<vmem>>, %arg12: memref<1x1x256xf32, #tpu.memory_space<vmem>>, %arg13: memref<1x256x128xbf16, #tpu.memory_space<vmem>>, %arg14: memref<1x1x128xf32, #tpu.memory_space<vmem>>, %arg15: memref<1x1x128xf32, #tpu.memory_space<vmem>>, %arg16: memref<1x1x128xf32, #tpu.memory_space<vmem>>, %arg17: memref<128x128xbf16, #tpu.memory_space<vmem>>, %arg18: memref<1x128xf32, #tpu.memory_space<vmem>>, %arg19: memref<128x128xbf16, #tpu.memory_space<vmem>>, %arg20: memref<1x128xf32, #tpu.memory_space<vmem>>, %arg21: memref<2x128xf32, #tpu.memory_space<vmem>>, %arg22: memref<16x128xf32, #tpu.memory_space<vmem>>) attributes {dimension_semantics = [#tpu.dimension_semantics<arbitrary>], iteration_bounds = array<i64: 2>, scalar_prefetch = 0 : i64, scratch_operands = 1 : i64, tpu.core_type = #tpu.core_type<tc>, window_params = [{pipeline_mode = #tpu.pipeline_mode<synchronous>, transform_indices = @transform_0, window_bounds = array<i64: 16, 128>}, {pipeline_mode = #tpu.pipeline_mode<synchronous>, transform_indices = @transform_1, window_bounds = array<i64: 2, 1, 8>}, {pipeline_mode = #tpu.pipeline_mode<synchronous>, transform_indices = @transform_2, window_bounds = array<i64: 1, 128>}, {pipeline_mode = #tpu.pipeline_mode<synchronous>, transform_indices = @transform_3, window_bounds = array<i64: 1, 128>}, {transform_indices = @transform_4, window_bounds = array<i64: 1, 128, 384>}, {transform_indices = @transform_5, window_bounds = array<i64: 1, 1, 384>}, {transform_indices = @transform_6, window_bounds = array<i64: 1, 128, 128>}, {transform_indices = @transform_7, window_bounds = array<i64: 1, 1, 128>}, {transform_indices = @transform_8, window_bounds = array<i64: 1, 1, 128>}, {transform_indices = @transform_9, window_bounds = array<i64: 1, 1, 128>}, {transform_indices = @transform_10, window_bounds = array<i64: 1, 128, 256>}, {transform_indices = @transform_11, window_bounds = array<i64: 1, 1, 256>}, {transform_indices = @transform_12, window_bounds = array<i64: 1, 256, 128>}, {transform_indices = @transform_13, window_bounds = array<i64: 1, 1, 128>}, {transform_indices = @transform_14, window_bounds = array<i64: 1, 1, 128>}, {transform_indices = @transform_15, window_bounds = array<i64: 1, 1, 128>}, {pipeline_mode = #tpu.pipeline_mode<synchronous>, transform_indices = @transform_16, window_bounds = array<i64: 128, 128>}, {pipeline_mode = #tpu.pipeline_mode<synchronous>, transform_indices = @transform_17, window_bounds = array<i64: 1, 128>}, {pipeline_mode = #tpu.pipeline_mode<synchronous>, transform_indices = @transform_18, window_bounds = array<i64: 128, 128>}, {pipeline_mode = #tpu.pipeline_mode<synchronous>, transform_indices = @transform_19, window_bounds = array<i64: 1, 128>}, {pipeline_mode = #tpu.pipeline_mode<synchronous>, transform_indices = @transform_20, window_bounds = array<i64: 2, 128>}]} {
    %c0_i32 = arith.constant 0 : i32
    %0 = arith.cmpi eq, %arg0, %c0_i32 : i32
    %1 = arith.extui %0 : i1 to i32
    %c0_i32_0 = arith.constant 0 : i32
    %2 = arith.cmpi ne, %1, %c0_i32_0 : i32
    scf.if %2 {
      %c0_71 = arith.constant 0 : index
      %c0_72 = arith.constant 0 : index
      %166 = vector.load %arg1[%c0_71, %c0_72] : memref<16x128xf32, #tpu.memory_space<vmem>>, vector<16x128xf32>
      %c0_73 = arith.constant 0 : index
      %c0_74 = arith.constant 0 : index
      %167 = vector.load %arg3[%c0_73, %c0_74] : memref<1x128xf32, #tpu.memory_space<vmem>>, vector<1x128xf32>
      %c0_75 = arith.constant 0 : index
      %c0_76 = arith.constant 0 : index
      %168 = vector.load %arg4[%c0_75, %c0_76] : memref<1x128xf32, #tpu.memory_space<vmem>>, vector<1x128xf32>
      %cst_77 = arith.constant dense<0.000000e+00> : vector<16xf32>
      %169 = vector.multi_reduction <add>, %166, %cst_77 [1] : vector<16x128xf32> to vector<16xf32>
      %170 = vector.shape_cast %169 : vector<16xf32> to vector<16x1xf32>
      %cst_78 = arith.constant 1.280000e+02 : f32
      %171 = vector.broadcast %cst_78 : f32 to vector<16x1xf32>
      %172 = arith.divf %170, %171 : vector<16x1xf32>
      %173 = vector.broadcast %172 : vector<16x1xf32> to vector<16x128xf32>
      %174 = arith.subf %166, %173 : vector<16x128xf32>
      %175 = arith.mulf %174, %174 : vector<16x128xf32>
      %cst_79 = arith.constant dense<0.000000e+00> : vector<16xf32>
      %176 = vector.multi_reduction <add>, %175, %cst_79 [1] : vector<16x128xf32> to vector<16xf32>
      %177 = vector.shape_cast %176 : vector<16xf32> to vector<16x1xf32>
      %cst_80 = arith.constant 1.280000e+02 : f32
      %178 = vector.broadcast %cst_80 : f32 to vector<16x1xf32>
      %179 = arith.divf %177, %178 : vector<16x1xf32>
      %180 = vector.broadcast %172 : vector<16x1xf32> to vector<16x128xf32>
      %181 = arith.subf %166, %180 : vector<16x128xf32>
      %cst_81 = arith.constant 9.99999996E-13 : f32
      %182 = vector.broadcast %cst_81 : f32 to vector<16x1xf32>
      %183 = arith.addf %179, %182 : vector<16x1xf32>
      %184 = math.rsqrt %183 : vector<16x1xf32>
      %185 = vector.broadcast %184 : vector<16x1xf32> to vector<16x128xf32>
      %186 = arith.mulf %181, %185 : vector<16x128xf32>
      %187 = vector.broadcast %167 : vector<1x128xf32> to vector<16x128xf32>
      %188 = arith.mulf %186, %187 : vector<16x128xf32>
      %189 = vector.broadcast %168 : vector<1x128xf32> to vector<16x128xf32>
      %190 = arith.addf %188, %189 : vector<16x128xf32>
      %c0_82 = arith.constant 0 : index
      %c0_83 = arith.constant 0 : index
      %191 = vector.load %arg22[%c0_82, %c0_83] : memref<16x128xf32, #tpu.memory_space<vmem>>, vector<16x128xf32>
      tpu.vector_store %arg22[%c0_82, %c0_83], %190 {strides = array<i32>} : memref<16x128xf32, #tpu.memory_space<vmem>>, vector<16x128xf32>,
    } else {
    }
    %c0 = arith.constant 0 : index
    %c0_1 = arith.constant 0 : index
    %3 = vector.load %arg22[%c0, %c0_1] : memref<16x128xf32, #tpu.memory_space<vmem>>, vector<16x128xf32>
    %4 = arith.truncf %3 : vector<16x128xf32> to vector<16x128xbf16>
    %c0_2 = arith.constant 0 : index
    %c0_3 = arith.constant 0 : index
    %c0_4 = arith.constant 0 : index
    %5 = vector.load %arg5[%c0_2, %c0_3, %c0_4] : memref<1x128x384xbf16, #tpu.memory_space<vmem>>, vector<1x128x384xbf16>
    %6 = vector.shape_cast %5 : vector<1x128x384xbf16> to vector<128x384xbf16>
    %cst = arith.constant dense<0.000000e+00> : vector<16x384xf32>
    %7 = tpu.matmul %4, %6, %cst {dimension_numbers = #tpu.dot_dimension_numbers<[1], [0], [0], [1], [0, 0, 1, 1], [], []>} : vector<16x128xbf16>, vector<128x384xbf16>, vector<16x384xf32> -> vector<16x384xf32>
    %c0_5 = arith.constant 0 : index
    %c0_6 = arith.constant 0 : index
    %c0_7 = arith.constant 0 : index
    %8 = vector.load %arg6[%c0_5, %c0_6, %c0_7] : memref<1x1x384xf32, #tpu.memory_space<vmem>>, vector<1x1x384xf32>
    %9 = vector.shape_cast %8 : vector<1x1x384xf32> to vector<1x384xf32>
    %10 = vector.broadcast %9 : vector<1x384xf32> to vector<16x384xf32>
    %11 = arith.addf %7, %10 : vector<16x384xf32>
    %12 = vector.extract_strided_slice %11 {offsets = [0, 0], sizes = [16, 128], strides = [1, 1]} : vector<16x384xf32> to vector<16x128xf32>
    %13 = vector.extract_strided_slice %11 {offsets = [0, 128], sizes = [16, 128], strides = [1, 1]} : vector<16x384xf32> to vector<16x128xf32>
    %14 = vector.extract_strided_slice %11 {offsets = [0, 256], sizes = [16, 128], strides = [1, 1]} : vector<16x384xf32> to vector<16x128xf32>
    %c0_8 = arith.constant 0 : index
    %c0_9 = arith.constant 0 : index
    %c0_10 = arith.constant 0 : index
    %15 = vector.load %arg2[%c0_8, %c0_9, %c0_10] : memref<2x1x8xf32, #tpu.memory_space<vmem>>, vector<2x1x8xf32>
    %16 = vector.extract_strided_slice %12 {offsets = [0, 0], sizes = [16, 64], strides = [1, 1]} : vector<16x128xf32> to vector<16x64xf32>
    %17 = arith.truncf %16 : vector<16x64xf32> to vector<16x64xbf16>
    %18 = vector.shape_cast %17 : vector<16x64xbf16> to vector<2x8x64xbf16>
    %19 = vector.extract_strided_slice %13 {offsets = [0, 0], sizes = [16, 64], strides = [1, 1]} : vector<16x128xf32> to vector<16x64xf32>
    %20 = arith.truncf %19 : vector<16x64xf32> to vector<16x64xbf16>
    %21 = vector.shape_cast %20 : vector<16x64xbf16> to vector<2x8x64xbf16>
    %22 = vector.extract_strided_slice %14 {offsets = [0, 0], sizes = [16, 64], strides = [1, 1]} : vector<16x128xf32> to vector<16x64xf32>
    %23 = arith.truncf %22 : vector<16x64xf32> to vector<16x64xbf16>
    %24 = vector.shape_cast %23 : vector<16x64xbf16> to vector<2x8x64xbf16>
    "tpu.trace_start"() <{level = 10 : i32, message = "bqd,bkd->bqk"}> : () -> ()
    %cst_11 = arith.constant dense<0.000000e+00> : vector<2x8x8xf32>
    %25 = tpu.matmul %18, %21, %cst_11 {dimension_numbers = #tpu.dot_dimension_numbers<[2], [2], [1], [1], [0, 0, 0, 1, 1, 1], [0], [0]>} : vector<2x8x64xbf16>, vector<2x8x64xbf16>, vector<2x8x8xf32> -> vector<2x8x8xf32>
    "tpu.trace_stop"() : () -> ()
    %cst_12 = arith.constant 1.250000e-01 : f32
    %26 = vector.broadcast %cst_12 : f32 to vector<2x8x8xf32>
    %27 = arith.mulf %25, %26 : vector<2x8x8xf32>
    %28 = vector.broadcast %15 : vector<2x1x8xf32> to vector<2x8x8xf32>
    %29 = arith.addf %27, %28 : vector<2x8x8xf32>
    %cst_13 = arith.constant dense<0xFF800000> : vector<2x8xf32>
    %30 = vector.multi_reduction <maximumf>, %29, %cst_13 [2] : vector<2x8x8xf32> to vector<2x8xf32>
    %31 = vector.shape_cast %30 : vector<2x8xf32> to vector<2x8x1xf32>
    %32 = vector.broadcast %31 : vector<2x8x1xf32> to vector<2x8x8xf32>
    %33 = arith.subf %29, %32 : vector<2x8x8xf32>
    %34 = math.exp %33 : vector<2x8x8xf32>
    %cst_14 = arith.constant dense<0.000000e+00> : vector<2x8xf32>
    %35 = vector.multi_reduction <add>, %34, %cst_14 [2] : vector<2x8x8xf32> to vector<2x8xf32>
    %36 = vector.shape_cast %35 : vector<2x8xf32> to vector<2x8x1xf32>
    %37 = tpu.reciprocal %36 {approx = true} : vector<2x8x1xf32> -> vector<2x8x1xf32>
    %38 = vector.broadcast %37 : vector<2x8x1xf32> to vector<2x8x8xf32>
    %39 = arith.mulf %34, %38 : vector<2x8x8xf32>
    %40 = arith.truncf %39 : vector<2x8x8xf32> to vector<2x8x8xbf16>
    "tpu.trace_start"() <{level = 10 : i32, message = "bqk,bkd->bqd"}> : () -> ()
    %cst_15 = arith.constant dense<0.000000e+00> : vector<2x8x64xf32>
    %41 = tpu.matmul %40, %24, %cst_15 {dimension_numbers = #tpu.dot_dimension_numbers<[2], [1], [1], [2], [0, 0, 0, 1, 1, 2], [0], [0]>} : vector<2x8x8xbf16>, vector<2x8x64xbf16>, vector<2x8x64xf32> -> vector<2x8x64xf32>
    "tpu.trace_stop"() : () -> ()
    %42 = vector.shape_cast %41 : vector<2x8x64xf32> to vector<16x64xf32>
    %43 = vector.extract_strided_slice %12 {offsets = [0, 64], sizes = [16, 64], strides = [1, 1]} : vector<16x128xf32> to vector<16x64xf32>
    %44 = arith.truncf %43 : vector<16x64xf32> to vector<16x64xbf16>
    %45 = vector.shape_cast %44 : vector<16x64xbf16> to vector<2x8x64xbf16>
    %46 = vector.extract_strided_slice %13 {offsets = [0, 64], sizes = [16, 64], strides = [1, 1]} : vector<16x128xf32> to vector<16x64xf32>
    %47 = arith.truncf %46 : vector<16x64xf32> to vector<16x64xbf16>
    %48 = vector.shape_cast %47 : vector<16x64xbf16> to vector<2x8x64xbf16>
    %49 = vector.extract_strided_slice %14 {offsets = [0, 64], sizes = [16, 64], strides = [1, 1]} : vector<16x128xf32> to vector<16x64xf32>
    %50 = arith.truncf %49 : vector<16x64xf32> to vector<16x64xbf16>
    %51 = vector.shape_cast %50 : vector<16x64xbf16> to vector<2x8x64xbf16>
    "tpu.trace_start"() <{level = 10 : i32, message = "bqd,bkd->bqk"}> : () -> ()
    %cst_16 = arith.constant dense<0.000000e+00> : vector<2x8x8xf32>
    %52 = tpu.matmul %45, %48, %cst_16 {dimension_numbers = #tpu.dot_dimension_numbers<[2], [2], [1], [1], [0, 0, 0, 1, 1, 1], [0], [0]>} : vector<2x8x64xbf16>, vector<2x8x64xbf16>, vector<2x8x8xf32> -> vector<2x8x8xf32>
    "tpu.trace_stop"() : () -> ()
    %cst_17 = arith.constant 1.250000e-01 : f32
    %53 = vector.broadcast %cst_17 : f32 to vector<2x8x8xf32>
    %54 = arith.mulf %52, %53 : vector<2x8x8xf32>
    %55 = vector.broadcast %15 : vector<2x1x8xf32> to vector<2x8x8xf32>
    %56 = arith.addf %54, %55 : vector<2x8x8xf32>
    %cst_18 = arith.constant dense<0xFF800000> : vector<2x8xf32>
    %57 = vector.multi_reduction <maximumf>, %56, %cst_18 [2] : vector<2x8x8xf32> to vector<2x8xf32>
    %58 = vector.shape_cast %57 : vector<2x8xf32> to vector<2x8x1xf32>
    %59 = vector.broadcast %58 : vector<2x8x1xf32> to vector<2x8x8xf32>
    %60 = arith.subf %56, %59 : vector<2x8x8xf32>
    %61 = math.exp %60 : vector<2x8x8xf32>
    %cst_19 = arith.constant dense<0.000000e+00> : vector<2x8xf32>
    %62 = vector.multi_reduction <add>, %61, %cst_19 [2] : vector<2x8x8xf32> to vector<2x8xf32>
    %63 = vector.shape_cast %62 : vector<2x8xf32> to vector<2x8x1xf32>
    %64 = tpu.reciprocal %63 {approx = true} : vector<2x8x1xf32> -> vector<2x8x1xf32>
    %65 = vector.broadcast %64 : vector<2x8x1xf32> to vector<2x8x8xf32>
    %66 = arith.mulf %61, %65 : vector<2x8x8xf32>
    %67 = arith.truncf %66 : vector<2x8x8xf32> to vector<2x8x8xbf16>
    "tpu.trace_start"() <{level = 10 : i32, message = "bqk,bkd->bqd"}> : () -> ()
    %cst_20 = arith.constant dense<0.000000e+00> : vector<2x8x64xf32>
    %68 = tpu.matmul %67, %51, %cst_20 {dimension_numbers = #tpu.dot_dimension_numbers<[2], [1], [1], [2], [0, 0, 0, 1, 1, 2], [0], [0]>} : vector<2x8x8xbf16>, vector<2x8x64xbf16>, vector<2x8x64xf32> -> vector<2x8x64xf32>
    "tpu.trace_stop"() : () -> ()
    %69 = vector.shape_cast %68 : vector<2x8x64xf32> to vector<16x64xf32>
    %70 = tpu.concatenate %42, %69 in 1 : vector<16x64xf32>, vector<16x64xf32> -> vector<16x128xf32>
    %71 = arith.truncf %70 : vector<16x128xf32> to vector<16x128xbf16>
    %c0_21 = arith.constant 0 : index
    %c0_22 = arith.constant 0 : index
    %c0_23 = arith.constant 0 : index
    %72 = vector.load %arg7[%c0_21, %c0_22, %c0_23] : memref<1x128x128xbf16, #tpu.memory_space<vmem>>, vector<1x128x128xbf16>
    %73 = vector.shape_cast %72 : vector<1x128x128xbf16> to vector<128x128xbf16>
    %cst_24 = arith.constant dense<0.000000e+00> : vector<16x128xf32>
    %74 = tpu.matmul %71, %73, %cst_24 {dimension_numbers = #tpu.dot_dimension_numbers<[1], [0], [0], [1], [0, 0, 1, 1], [], []>} : vector<16x128xbf16>, vector<128x128xbf16>, vector<16x128xf32> -> vector<16x128xf32>
    %c0_25 = arith.constant 0 : index
    %c0_26 = arith.constant 0 : index
    %c0_27 = arith.constant 0 : index
    %75 = vector.load %arg8[%c0_25, %c0_26, %c0_27] : memref<1x1x128xf32, #tpu.memory_space<vmem>>, vector<1x1x128xf32>
    %76 = vector.shape_cast %75 : vector<1x1x128xf32> to vector<1x128xf32>
    %77 = vector.broadcast %76 : vector<1x128xf32> to vector<16x128xf32>
    %78 = arith.addf %74, %77 : vector<16x128xf32>
    %79 = arith.addf %78, %3 : vector<16x128xf32>
    %c0_28 = arith.constant 0 : index
    %c0_29 = arith.constant 0 : index
    %c0_30 = arith.constant 0 : index
    %80 = vector.load %arg9[%c0_28, %c0_29, %c0_30] : memref<1x1x128xf32, #tpu.memory_space<vmem>>, vector<1x1x128xf32>
    %81 = vector.shape_cast %80 : vector<1x1x128xf32> to vector<1x128xf32>
    %c0_31 = arith.constant 0 : index
    %c0_32 = arith.constant 0 : index
    %c0_33 = arith.constant 0 : index
    %82 = vector.load %arg10[%c0_31, %c0_32, %c0_33] : memref<1x1x128xf32, #tpu.memory_space<vmem>>, vector<1x1x128xf32>
    %83 = vector.shape_cast %82 : vector<1x1x128xf32> to vector<1x128xf32>
    %cst_34 = arith.constant dense<0.000000e+00> : vector<16xf32>
    %84 = vector.multi_reduction <add>, %79, %cst_34 [1] : vector<16x128xf32> to vector<16xf32>
    %85 = vector.shape_cast %84 : vector<16xf32> to vector<16x1xf32>
    %cst_35 = arith.constant 1.280000e+02 : f32
    %86 = vector.broadcast %cst_35 : f32 to vector<16x1xf32>
    %87 = arith.divf %85, %86 : vector<16x1xf32>
    %88 = vector.broadcast %87 : vector<16x1xf32> to vector<16x128xf32>
    %89 = arith.subf %79, %88 : vector<16x128xf32>
    %90 = arith.mulf %89, %89 : vector<16x128xf32>
    %cst_36 = arith.constant dense<0.000000e+00> : vector<16xf32>
    %91 = vector.multi_reduction <add>, %90, %cst_36 [1] : vector<16x128xf32> to vector<16xf32>
    %92 = vector.shape_cast %91 : vector<16xf32> to vector<16x1xf32>
    %cst_37 = arith.constant 1.280000e+02 : f32
    %93 = vector.broadcast %cst_37 : f32 to vector<16x1xf32>
    %94 = arith.divf %92, %93 : vector<16x1xf32>
    %95 = vector.broadcast %87 : vector<16x1xf32> to vector<16x128xf32>
    %96 = arith.subf %79, %95 : vector<16x128xf32>
    %cst_38 = arith.constant 9.99999996E-13 : f32
    %97 = vector.broadcast %cst_38 : f32 to vector<16x1xf32>
    %98 = arith.addf %94, %97 : vector<16x1xf32>
    %99 = math.rsqrt %98 : vector<16x1xf32>
    %100 = vector.broadcast %99 : vector<16x1xf32> to vector<16x128xf32>
    %101 = arith.mulf %96, %100 : vector<16x128xf32>
    %102 = vector.broadcast %81 : vector<1x128xf32> to vector<16x128xf32>
    %103 = arith.mulf %101, %102 : vector<16x128xf32>
    %104 = vector.broadcast %83 : vector<1x128xf32> to vector<16x128xf32>
    %105 = arith.addf %103, %104 : vector<16x128xf32>
    %106 = arith.truncf %105 : vector<16x128xf32> to vector<16x128xbf16>
    %c0_39 = arith.constant 0 : index
    %c0_40 = arith.constant 0 : index
    %c0_41 = arith.constant 0 : index
    %107 = vector.load %arg11[%c0_39, %c0_40, %c0_41] : memref<1x128x256xbf16, #tpu.memory_space<vmem>>, vector<1x128x256xbf16>
    %108 = vector.shape_cast %107 : vector<1x128x256xbf16> to vector<128x256xbf16>
    %cst_42 = arith.constant dense<0.000000e+00> : vector<16x256xf32>
    %109 = tpu.matmul %106, %108, %cst_42 {dimension_numbers = #tpu.dot_dimension_numbers<[1], [0], [0], [1], [0, 0, 1, 1], [], []>} : vector<16x128xbf16>, vector<128x256xbf16>, vector<16x256xf32> -> vector<16x256xf32>
    %c0_43 = arith.constant 0 : index
    %c0_44 = arith.constant 0 : index
    %c0_45 = arith.constant 0 : index
    %110 = vector.load %arg12[%c0_43, %c0_44, %c0_45] : memref<1x1x256xf32, #tpu.memory_space<vmem>>, vector<1x1x256xf32>
    %111 = vector.shape_cast %110 : vector<1x1x256xf32> to vector<1x256xf32>
    %112 = vector.broadcast %111 : vector<1x256xf32> to vector<16x256xf32>
    %113 = arith.addf %109, %112 : vector<16x256xf32>
    %114 = arith.mulf %113, %113 : vector<16x256xf32>
    %115 = arith.mulf %113, %114 : vector<16x256xf32>
    %cst_46 = arith.constant 4.471500e-02 : f32
    %116 = vector.broadcast %cst_46 : f32 to vector<16x256xf32>
    %117 = arith.mulf %116, %115 : vector<16x256xf32>
    %118 = arith.addf %113, %117 : vector<16x256xf32>
    %cst_47 = arith.constant 0.797884583 : f32
    %119 = vector.broadcast %cst_47 : f32 to vector<16x256xf32>
    %120 = arith.mulf %119, %118 : vector<16x256xf32>
    %121 = math.tanh %120 : vector<16x256xf32>
    %cst_48 = arith.constant 1.000000e+00 : f32
    %122 = vector.broadcast %cst_48 : f32 to vector<16x256xf32>
    %123 = arith.addf %122, %121 : vector<16x256xf32>
    %cst_49 = arith.constant 5.000000e-01 : f32
    %124 = vector.broadcast %cst_49 : f32 to vector<16x256xf32>
    %125 = arith.mulf %124, %123 : vector<16x256xf32>
    %126 = arith.mulf %113, %125 : vector<16x256xf32>
    %127 = arith.truncf %126 : vector<16x256xf32> to vector<16x256xbf16>
    %c0_50 = arith.constant 0 : index
    %c0_51 = arith.constant 0 : index
    %c0_52 = arith.constant 0 : index
    %128 = vector.load %arg13[%c0_50, %c0_51, %c0_52] : memref<1x256x128xbf16, #tpu.memory_space<vmem>>, vector<1x256x128xbf16>
    %129 = vector.shape_cast %128 : vector<1x256x128xbf16> to vector<256x128xbf16>
    %cst_53 = arith.constant dense<0.000000e+00> : vector<16x128xf32>
    %130 = tpu.matmul %127, %129, %cst_53 {dimension_numbers = #tpu.dot_dimension_numbers<[1], [0], [0], [1], [0, 0, 1, 1], [], []>} : vector<16x256xbf16>, vector<256x128xbf16>, vector<16x128xf32> -> vector<16x128xf32>
    %c0_54 = arith.constant 0 : index
    %c0_55 = arith.constant 0 : index
    %c0_56 = arith.constant 0 : index
    %131 = vector.load %arg14[%c0_54, %c0_55, %c0_56] : memref<1x1x128xf32, #tpu.memory_space<vmem>>, vector<1x1x128xf32>
    %132 = vector.shape_cast %131 : vector<1x1x128xf32> to vector<1x128xf32>
    %133 = vector.broadcast %132 : vector<1x128xf32> to vector<16x128xf32>
    %134 = arith.addf %130, %133 : vector<16x128xf32>
    %135 = arith.addf %134, %105 : vector<16x128xf32>
    %c0_57 = arith.constant 0 : index
    %c0_58 = arith.constant 0 : index
    %c0_59 = arith.constant 0 : index
    %136 = vector.load %arg15[%c0_57, %c0_58, %c0_59] : memref<1x1x128xf32, #tpu.memory_space<vmem>>, vector<1x1x128xf32>
    %137 = vector.shape_cast %136 : vector<1x1x128xf32> to vector<1x128xf32>
    %c0_60 = arith.constant 0 : index
    %c0_61 = arith.constant 0 : index
    %c0_62 = arith.constant 0 : index
    %138 = vector.load %arg16[%c0_60, %c0_61, %c0_62] : memref<1x1x128xf32, #tpu.memory_space<vmem>>, vector<1x1x128xf32>
    %139 = vector.shape_cast %138 : vector<1x1x128xf32> to vector<1x128xf32>
    %cst_63 = arith.constant dense<0.000000e+00> : vector<16xf32>
    %140 = vector.multi_reduction <add>, %135, %cst_63 [1] : vector<16x128xf32> to vector<16xf32>
    %141 = vector.shape_cast %140 : vector<16xf32> to vector<16x1xf32>
    %cst_64 = arith.constant 1.280000e+02 : f32
    %142 = vector.broadcast %cst_64 : f32 to vector<16x1xf32>
    %143 = arith.divf %141, %142 : vector<16x1xf32>
    %144 = vector.broadcast %143 : vector<16x1xf32> to vector<16x128xf32>
    %145 = arith.subf %135, %144 : vector<16x128xf32>
    %146 = arith.mulf %145, %145 : vector<16x128xf32>
    %cst_65 = arith.constant dense<0.000000e+00> : vector<16xf32>
    %147 = vector.multi_reduction <add>, %146, %cst_65 [1] : vector<16x128xf32> to vector<16xf32>
    %148 = vector.shape_cast %147 : vector<16xf32> to vector<16x1xf32>
    %cst_66 = arith.constant 1.280000e+02 : f32
    %149 = vector.broadcast %cst_66 : f32 to vector<16x1xf32>
    %150 = arith.divf %148, %149 : vector<16x1xf32>
    %151 = vector.broadcast %143 : vector<16x1xf32> to vector<16x128xf32>
    %152 = arith.subf %135, %151 : vector<16x128xf32>
    %cst_67 = arith.constant 9.99999996E-13 : f32
    %153 = vector.broadcast %cst_67 : f32 to vector<16x1xf32>
    %154 = arith.addf %150, %153 : vector<16x1xf32>
    %155 = math.rsqrt %154 : vector<16x1xf32>
    %156 = vector.broadcast %155 : vector<16x1xf32> to vector<16x128xf32>
    %157 = arith.mulf %152, %156 : vector<16x128xf32>
    %158 = vector.broadcast %137 : vector<1x128xf32> to vector<16x128xf32>
    %159 = arith.mulf %157, %158 : vector<16x128xf32>
    %160 = vector.broadcast %139 : vector<1x128xf32> to vector<16x128xf32>
    %161 = arith.addf %159, %160 : vector<16x128xf32>
    %c0_68 = arith.constant 0 : index
    %c0_69 = arith.constant 0 : index
    %162 = vector.load %arg22[%c0_68, %c0_69] : memref<16x128xf32, #tpu.memory_space<vmem>>, vector<16x128xf32>
    tpu.vector_store %arg22[%c0_68, %c0_69], %161 {strides = array<i32>} : memref<16x128xf32, #tpu.memory_space<vmem>>, vector<16x128xf32>,
    %c1_i32 = arith.constant 1 : i32
    %163 = arith.cmpi eq, %arg0, %c1_i32 : i32
    %164 = arith.extui %163 : i1 to i32
    %c0_i32_70 = arith.constant 0 : i32
    %165 = arith.cmpi ne, %164, %c0_i32_70 : i32
    scf.if %165 {
      %166 = vector.extract_strided_slice %161 {offsets = [0, 0], sizes = [1, 128], strides = [1, 1]} : vector<16x128xf32> to vector<1x128xf32>
      %167 = vector.extract_strided_slice %161 {offsets = [8, 0], sizes = [1, 128], strides = [1, 1]} : vector<16x128xf32> to vector<1x128xf32>
      %168 = tpu.concatenate %166, %167 in 0 : vector<1x128xf32>, vector<1x128xf32> -> vector<2x128xf32>
      %169 = arith.truncf %168 : vector<2x128xf32> to vector<2x128xbf16>
      %c0_71 = arith.constant 0 : index
      %c0_72 = arith.constant 0 : index
      %170 = vector.load %arg17[%c0_71, %c0_72] : memref<128x128xbf16, #tpu.memory_space<vmem>>, vector<128x128xbf16>
      %cst_73 = arith.constant dense<0.000000e+00> : vector<2x128xf32>
      %171 = tpu.matmul %169, %170, %cst_73 {dimension_numbers = #tpu.dot_dimension_numbers<[1], [0], [0], [1], [0, 0, 1, 1], [], []>} : vector<2x128xbf16>, vector<128x128xbf16>, vector<2x128xf32> -> vector<2x128xf32>
      %c0_74 = arith.constant 0 : index
      %c0_75 = arith.constant 0 : index
      %172 = vector.load %arg18[%c0_74, %c0_75] : memref<1x128xf32, #tpu.memory_space<vmem>>, vector<1x128xf32>
      %173 = vector.broadcast %172 : vector<1x128xf32> to vector<2x128xf32>
      %174 = arith.addf %171, %173 : vector<2x128xf32>
      %175 = math.tanh %174 : vector<2x128xf32>
      %176 = arith.truncf %175 : vector<2x128xf32> to vector<2x128xbf16>
      %c0_76 = arith.constant 0 : index
      %c0_77 = arith.constant 0 : index
      %177 = vector.load %arg19[%c0_76, %c0_77] : memref<128x128xbf16, #tpu.memory_space<vmem>>, vector<128x128xbf16>
      %cst_78 = arith.constant dense<0.000000e+00> : vector<2x128xf32>
      %178 = tpu.matmul %176, %177, %cst_78 {dimension_numbers = #tpu.dot_dimension_numbers<[1], [0], [0], [1], [0, 0, 1, 1], [], []>} : vector<2x128xbf16>, vector<128x128xbf16>, vector<2x128xf32> -> vector<2x128xf32>
      %c0_79 = arith.constant 0 : index
      %c0_80 = arith.constant 0 : index
      %179 = vector.load %arg20[%c0_79, %c0_80] : memref<1x128xf32, #tpu.memory_space<vmem>>, vector<1x128xf32>
      %180 = vector.broadcast %179 : vector<1x128xf32> to vector<2x128xf32>
      %181 = arith.addf %178, %180 : vector<2x128xf32>
      %182 = math.tanh %181 : vector<2x128xf32>
      %c0_81 = arith.constant 0 : index
      %c0_82 = arith.constant 0 : index
      %183 = vector.load %arg21[%c0_81, %c0_82] : memref<2x128xf32, #tpu.memory_space<vmem>>, vector<2x128xf32>
      tpu.vector_store %arg21[%c0_81, %c0_82], %182 {strides = array<i32>} : memref<2x128xf32, #tpu.memory_space<vmem>>, vector<2x128xf32>,
    } else {
    }
    return
  }
  func.func @transform_0(%arg0: i32) -> (i32, i32) {
    %c0_i32 = arith.constant 0 : i32
    %c0_i32_0 = arith.constant 0 : i32
    %c0_i32_1 = arith.constant 0 : i32
    return %c0_i32, %c0_i32_0 : i32, i32
  }
  func.func @transform_1(%arg0: i32) -> (i32, i32, i32) {
    %c0_i32 = arith.constant 0 : i32
    %c0_i32_0 = arith.constant 0 : i32
    %c0_i32_1 = arith.constant 0 : i32
    %c0_i32_2 = arith.constant 0 : i32
    return %c0_i32, %c0_i32_0, %c0_i32_1 : i32, i32, i32
  }
  func.func @transform_2(%arg0: i32) -> (i32, i32) {
    %c0_i32 = arith.constant 0 : i32
    %c0_i32_0 = arith.constant 0 : i32
    %c0_i32_1 = arith.constant 0 : i32
    return %c0_i32, %c0_i32_0 : i32, i32
  }
  func.func @transform_3(%arg0: i32) -> (i32, i32) {
    %c0_i32 = arith.constant 0 : i32
    %c0_i32_0 = arith.constant 0 : i32
    %c0_i32_1 = arith.constant 0 : i32
    return %c0_i32, %c0_i32_0 : i32, i32
  }
  func.func @transform_4(%arg0: i32) -> (i32, i32, i32) {
    %c0_i32 = arith.constant 0 : i32
    %c0_i32_0 = arith.constant 0 : i32
    %c0_i32_1 = arith.constant 0 : i32
    return %arg0, %c0_i32, %c0_i32_0 : i32, i32, i32
  }
  func.func @transform_5(%arg0: i32) -> (i32, i32, i32) {
    %c0_i32 = arith.constant 0 : i32
    %c0_i32_0 = arith.constant 0 : i32
    %c0_i32_1 = arith.constant 0 : i32
    return %arg0, %c0_i32, %c0_i32_0 : i32, i32, i32
  }
  func.func @transform_6(%arg0: i32) -> (i32, i32, i32) {
    %c0_i32 = arith.constant 0 : i32
    %c0_i32_0 = arith.constant 0 : i32
    %c0_i32_1 = arith.constant 0 : i32
    return %arg0, %c0_i32, %c0_i32_0 : i32, i32, i32
  }
  func.func @transform_7(%arg0: i32) -> (i32, i32, i32) {
    %c0_i32 = arith.constant 0 : i32
    %c0_i32_0 = arith.constant 0 : i32
    %c0_i32_1 = arith.constant 0 : i32
    return %arg0, %c0_i32, %c0_i32_0 : i32, i32, i32
  }
  func.func @transform_8(%arg0: i32) -> (i32, i32, i32) {
    %c0_i32 = arith.constant 0 : i32
    %c0_i32_0 = arith.constant 0 : i32
    %c0_i32_1 = arith.constant 0 : i32
    return %arg0, %c0_i32, %c0_i32_0 : i32, i32, i32
  }
  func.func @transform_9(%arg0: i32) -> (i32, i32, i32) {
    %c0_i32 = arith.constant 0 : i32
    %c0_i32_0 = arith.constant 0 : i32
    %c0_i32_1 = arith.constant 0 : i32
    return %arg0, %c0_i32, %c0_i32_0 : i32, i32, i32
  }
  func.func @transform_10(%arg0: i32) -> (i32, i32, i32) {
    %c0_i32 = arith.constant 0 : i32
    %c0_i32_0 = arith.constant 0 : i32
    %c0_i32_1 = arith.constant 0 : i32
    return %arg0, %c0_i32, %c0_i32_0 : i32, i32, i32
  }
  func.func @transform_11(%arg0: i32) -> (i32, i32, i32) {
    %c0_i32 = arith.constant 0 : i32
    %c0_i32_0 = arith.constant 0 : i32
    %c0_i32_1 = arith.constant 0 : i32
    return %arg0, %c0_i32, %c0_i32_0 : i32, i32, i32
  }
  func.func @transform_12(%arg0: i32) -> (i32, i32, i32) {
    %c0_i32 = arith.constant 0 : i32
    %c0_i32_0 = arith.constant 0 : i32
    %c0_i32_1 = arith.constant 0 : i32
    return %arg0, %c0_i32, %c0_i32_0 : i32, i32, i32
  }
  func.func @transform_13(%arg0: i32) -> (i32, i32, i32) {
    %c0_i32 = arith.constant 0 : i32
    %c0_i32_0 = arith.constant 0 : i32
    %c0_i32_1 = arith.constant 0 : i32
    return %arg0, %c0_i32, %c0_i32_0 : i32, i32, i32
  }
  func.func @transform_14(%arg0: i32) -> (i32, i32, i32) {
    %c0_i32 = arith.constant 0 : i32
    %c0_i32_0 = arith.constant 0 : i32
    %c0_i32_1 = arith.constant 0 : i32
    return %arg0, %c0_i32, %c0_i32_0 : i32, i32, i32
  }
  func.func @transform_15(%arg0: i32) -> (i32, i32, i32) {
    %c0_i32 = arith.constant 0 : i32
    %c0_i32_0 = arith.constant 0 : i32
    %c0_i32_1 = arith.constant 0 : i32
    return %arg0, %c0_i32, %c0_i32_0 : i32, i32, i32
  }
  func.func @transform_16(%arg0: i32) -> (i32, i32) {
    %c0_i32 = arith.constant 0 : i32
    %c0_i32_0 = arith.constant 0 : i32
    %c0_i32_1 = arith.constant 0 : i32
    return %c0_i32, %c0_i32_0 : i32, i32
  }
  func.func @transform_17(%arg0: i32) -> (i32, i32) {
    %c0_i32 = arith.constant 0 : i32
    %c0_i32_0 = arith.constant 0 : i32
    %c0_i32_1 = arith.constant 0 : i32
    return %c0_i32, %c0_i32_0 : i32, i32
  }
  func.func @transform_18(%arg0: i32) -> (i32, i32) {
    %c0_i32 = arith.constant 0 : i32
    %c0_i32_0 = arith.constant 0 : i32
    %c0_i32_1 = arith.constant 0 : i32
    return %c0_i32, %c0_i32_0 : i32, i32
  }
  func.func @transform_19(%arg0: i32) -> (i32, i32) {
    %c0_i32 = arith.constant 0 : i32
    %c0_i32_0 = arith.constant 0 : i32
    %c0_i32_1 = arith.constant 0 : i32
    return %c0_i32, %c0_i32_0 : i32, i32
  }
  func.func @transform_20(%arg0: i32) -> (i32, i32) {
    %c0_i32 = arith.constant 0 : i32
    %c0_i32_0 = arith.constant 0 : i32
    %c0_i32_1 = arith.constant 0 : i32
    return %c0_i32, %c0_i32_0 : i32, i32
  }
}

</mosaic_0001>

<bundles_post_ra>
// kernel: bert_encoder_call.1
= control target key start
LH: loop header
LB: loop body
LE: loop exit
PB: predicated region body
PF: predicated region fallthrough
CT: control target
= control target key end

     0   :  { %s4444_s0 = inlined_call_operand.hbm [shape: f32[16,128], index: 0, kind: input, shape index: {}]   ;;  %s4445_s1 = inlined_call_operand.hbm [shape: f32[2,1,8], index: 1, kind: input, shape index: {}]   ;;  %s4446_s2 = inlined_call_operand.hbm [shape: f32[1,128], index: 2, kind: input, shape index: {}]   ;;  %s4447_s3 = inlined_call_operand.hbm [shape: f32[1,128], index: 3, kind: input, shape index: {}]   ;;  %s4448_s4 = inlined_call_operand.hbm [shape: bf16[2,128,384], index: 4, kind: input, shape index: {}]   ;;  %s4449_s5 = inlined_call_operand.hbm [shape: f32[2,1,384], index: 5, kind: input, shape index: {}]   ;;  %s4450_s6 = inlined_call_operand.hbm [shape: bf16[2,128,128], index: 6, kind: input, shape index: {}]   ;;  %s4451_s7 = inlined_call_operand.vmem [shape: f32[2,1,128], index: 7, kind: input, shape index: {}]   ;;  %s4452_s8 = inlined_call_operand.vmem [shape: f32[2,1,128], index: 8, kind: input, shape index: {}]   ;;  %s4453_s9 = inlined_call_operand.vmem [shape: f32[2,1,128], index: 9, kind: input, shape index: {}]   ;;  %s4454_s10 = inlined_call_operand.hbm [shape: bf16[2,128,256], index: 10, kind: input, shape index: {}]   ;;  %s4455_s11 = inlined_call_operand.hbm [shape: f32[2,1,256], index: 11, kind: input, shape index: {}]   ;;  %s4456_s12 = inlined_call_operand.hbm [shape: bf16[2,256,128], index: 12, kind: input, shape index: {}]   ;;  %s4457_s13 = inlined_call_operand.hbm [shape: f32[2,1,128], index: 13, kind: input, shape index: {}]   ;;  %s4458_s14 = inlined_call_operand.vmem [shape: f32[2,1,128], index: 14, kind: input, shape index: {}]   ;;  %s4459_s15 = inlined_call_operand.vmem [shape: f32[2,1,128], index: 15, kind: input, shape index: {}]   ;;  %s4460_s16 = inlined_call_operand.hbm [shape: bf16[128,128], index: 16, kind: input, shape index: {}]   ;;  %s4461_s17 = inlined_call_operand.vmem [shape: f32[1,128], index: 17, kind: input, shape index: {}]   ;;  %s4462_s18 = inlined_call_operand.hbm [shape: bf16[128,128], index: 18, kind: input, shape index: {}]   ;;  %s4463_s19 = inlined_call_operand.hbm [shape: f32[1,128], index: 19, kind: input, shape index: {}]   ;;  %s4464_s20 = inlined_call_operand.hbm [shape: f32[2,128], index: 20, kind: output, shape index: {}]  }
   0x1   :  { %4484 = sst [smem:[#allocation38_spill]] %s4444_s0 }
   0x2   :  { %4485 = sst [smem:[#allocation39_spill]] %s4445_s1 }
   0x3   :  { %4486 = sst [smem:[#allocation40_spill]] %s4446_s2 }
   0x4   :  { %4487 = sst [smem:[#allocation41_spill]] %s4447_s3 }
   0x5   :  { %4488 = sst [smem:[#allocation42_spill]] %s4448_s4 }
   0x6   :  { %4489 = sst [smem:[#allocation43_spill]] %s4449_s5 }
   0x7   :  { %4490 = sst [smem:[#allocation44_spill]] %s4450_s6 }
   0x8   :  { %4491 = sst [smem:[#allocation45_spill]] %s4451_s7 }
   0x9   :  { %4492 = sst [smem:[#allocation46_spill]] %s4452_s8 }
   0xa   :  { %4493 = sst [smem:[#allocation47_spill]] %s4453_s9 }
   0xb   :  { %4494 = sst [smem:[#allocation48_spill]] %s4454_s10 }
   0xc   :  { %4495 = sst [smem:[#allocation49_spill]] %s4455_s11 }
   0xd   :  { %4496 = sst [smem:[#allocation50_spill]] %s4456_s12 }
   0xe   :  { %4497 = sst [smem:[#allocation51_spill]] %s4458_s14 }
   0xf   :  { %4498 = sst [smem:[#allocation52_spill]] %s4459_s15 }
  0x10   :  { %4499 = sst [smem:[#allocation53_spill]] %s4461_s17 }
  0x11   :  { %4500 = sst [smem:[#allocation54_spill]] %s4464_s20 }
  0x12   :  { %25 = vsyncpa [#allocation4], 0 }
  0x13   :  { %26 = vsyncpa [#allocation7], 0 }
  0x14   :  { %27 = vsyncpa [#allocation10], 0 }
  0x15   :  { %28 = vsyncpa [#allocation21], 0 }
  0x16   :  { %29 = vsyncpa [#allocation5], 0  ;;  %s3885_s1 = smov 0   ;;  %s3887_s22 = smov 0  }
  0x17   :  { %s3889_s23 = smov 0   ;;  %s3891_s24 = smov 0  }
  0x18 LB: > { %4501 = sst [smem:[#allocation31_spill]] %s3751_s22  ;;  %s3907_s27 = sadd.s32 4294967295, %s3759_s24   ;;  %s3759_s24 = sphi %s3891_s24, %s4548_s24   ;;  %s3755_s23 = sphi %s3889_s23, %s4551_s23   ;;  %s3751_s22 = sphi %s3887_s22, %s4550_s22   ;;  %s3747_s1 = sphi %s3885_s1, %s4549_s1  }
  0x19   : > { %4502 = sst [smem:[#allocation32_spill]] %s3755_s23  ;;  %p2574_p0 = scmp.ge.s32.totalorder %s3759_s24, 1 }
  0x1a   : > { %s4503_s3 = sld [smem:[#allocation38_spill]]  ;;  %p140_p1 = scmp.eq.s32.totalorder %s3907_s27, 0 }
  0x1b   : > { %4504 = sst [smem:[#allocation33_spill]] %s3907_s27  ;;  %p541_p2 = scmp.lt.s32.totalorder %s3759_s24, 3 }
  0x1c   : > { %p2575_p3 = scmp.ne.s32.totalorder %s3907_s27, 0  ;;  %s3761_s4 = smov [#allocation3]  }
  0x1d   : > { %p3913_p4 = pnand %p2574_p0, %p541_p2  ;;  %s554_s29 = sshll.u32 %s3761_s4, 4  ;;  %s555_s29 = int_to_ptr.vmem [resolvable:$true] %s554_s29 }
  0x1e   : > { %s4466_s0 = smov 128   ;;  %s4467_s21 = smov 8  }
  0x1f   : > { %s4505_s28 = scalar_select %p3913_p4, 1, 0 }
  0x20   : > { %s552_s26 = sshll.u32 %s4503_s3, 4  ;;  %p3076_p5 = pneg %p3913_p4  ;;  %s553_s26 = int_to_ptr.hbm [resolvable:$true] %s552_s26 }
  0x21   : > { %4506 = sst [smem:[#allocation34_spill]] %s4505_s28  ;;  %s3931_s2 = sadd.s32 1, %s3759_s24  }
  0x22   : > { %p3921_p6 = pnand %p3076_p5, %p140_p1  ;;  %4508 = sst [smem:[#allocation35_spill]] %s3931_s2 }
  0x23   : > { %s123_s25 = ssub.s32 %s3759_s24, %s3931_s2  ;;  %s126_s3 = sadd.s32 1, %s3755_s23 }
  0x24   : > { %3079 = dma.hbm_to_vmem [thread:$0]  (!%p3921_p6), %s553_s26, 256, %s555_s29, [#allocation4], %s4466_s0, %s4466_s0, %s4467_s21  }
  0x25   : > { %p124_p7 = scmp.eq.s32.totalorder %s123_s25, 0  ;;  %p133_p8 = scmp.ne.s32.totalorder %s3755_s23, %s3751_s22 }
  0x26   : > { %p134_p9 = scmp.eq.s32.totalorder %s3759_s24, 0  ;;  %p139_p10 = scmp.ne.s32.totalorder %s3751_s22, %s3747_s1 }
  0x27   : > { %s3941_s4 = scalar_select %p124_p7, %s3755_s23, %s126_s3  }
  0x28   : > { %p135_p11 = por %p134_p9, %p133_p8  ;;  %p3945_p12 = por %p140_p1, %p139_p10 }
  0x29   : > { %4509 = sst [smem:[#allocation36_spill]] %s3941_s4  ;;  %p3127_p13 = scmp.lt.s32.totalorder %s3759_s24, 2 }
  0x2a   : > { %s4510_s20 = scalar_select %p3945_p12, 1, 0 }
  0x2b   : > { %s649_s26 = sand.u32 1, %s3759_s24   ;;  %s3952_s29 = sand.u32 1, %s3755_s23  }
  0x2c   : > { %4511 = sst [smem:[#allocation37_spill]] %s4510_s20  ;;  %s3024_s0 = smul.u32 192, %s3952_s29 }
  0x2d   : > { %p3955_p0 = pnand %p3127_p13, %p135_p11  ;;  %s3025_s1 = smul.u32 192, %s3759_s24 }
  0x2e   : > { %s4513_s4 = sld [smem:[#allocation42_spill]]  ;;  %s653_s17 = scalar_lea.vmem [#allocation11], %s3024_s0 }
  0x2f   : > { %s661_s15 = sshll.u32 %s653_s17, 4  ;;  %s3963_s9 = scalar_lea.sflag [#allocation4], %s649_s26  ;;  %s662_s15 = int_to_ptr.vmem [resolvable:$true] %s661_s15 }
  0x30   : > { %p3967_p5 = pneg %p3955_p0 }
  0x34   : > { %s658_s2 = scalar_lea.hbm %s4513_s4, %s3025_s1 }
  0x35   : > { %s659_s14 = sshll.u32 %s658_s2, 4  ;;  %s3286_s2 = scalar_lea.hbm %s4513_s4, 384  ;;  %s660_s14 = int_to_ptr.hbm [resolvable:$true] %s659_s14 }
  0x36   : > { %s3279_s23 = sshra.s32 %s660_s14, 4  ;;  %s3280_s23 = int_to_ptr.hbm [resolvable:$true] %s3279_s23 }
  0x37   : > { %s3281_s8 = scalar_lea.hbm %s3280_s23, 192  ;;  %p3287_p9 = scmp.lt.s32.totalorder %s3280_s23, %s4513_s4 }
  0x38   : > { %p3282_p2 = scmp.ne.s32.totalorder %s3280_s23, %s3281_s8  ;;  %p3288_p10 = scmp.lt.s32.totalorder %s3286_s2, %s3281_s8 }
  0x3a   : > { %p3284_p7 = pnand %p3967_p5, %p3282_p2  ;;  %p3289_p11 = por %p3288_p10, %p3287_p9 }
  0x3c   : > { %p3285_p8 = pneg %p3284_p7 }
  0x3e   : > { %p3290_p13 = pnand %p3289_p11, %p3285_p8 }
  0x40   : > { %3293 = shalt.err (!%p3290_p13)
}
  0x41   : > { %s3764_s25 = smov 192   ;;  %s3765_s3 = smov 12  }
  0x42   : > { %3101 = dma.hbm_to_vmem [thread:$0]  (!%p3955_p0), %s660_s14, 3072, %s662_s15, %s3963_s9, %s3764_s25, %s3764_s25, %s3765_s3  }
  0x43   : > { %s3026_s0 = smul.u32 3, %s3952_s29  ;;  %s2584_s20 = sshll.u32 %s3952_s29, 6 }
  0x44   : > { %s3027_s17 = smul.u32 3, %s3759_s24  ;;  %s4515_s5 = sld [smem:[#allocation43_spill]] }
  0x45   : > { %s675_s23 = scalar_lea.vmem [#allocation12], %s3026_s0 }
  0x46   : > { %s683_s2 = sshll.u32 %s675_s23, 4  ;;  %s684_s2 = int_to_ptr.vmem [resolvable:$true] %s683_s2 }
  0x4a   : > { %s679_s8 = scalar_lea.hbm %s4515_s5, %s3027_s17  ;;  %s3316_s25 = scalar_lea.hbm %s4515_s5, 6 }
  0x4b   : > { %s681_s26 = sshll.u32 %s679_s8, 4  ;;  %s682_s26 = int_to_ptr.hbm [resolvable:$true] %s681_s26 }
  0x4c   : > { %s3309_s4 = sshra.s32 %s682_s26, 4  ;;  %s3310_s4 = int_to_ptr.hbm [resolvable:$true] %s3309_s4 }
  0x4d   : > { %s3311_s27 = scalar_lea.hbm %s3310_s4, 3  ;;  %p3317_p9 = scmp.lt.s32.totalorder %s3310_s4, %s4515_s5 }
  0x4e   : > { %p3312_p2 = scmp.ne.s32.totalorder %s3310_s4, %s3311_s27  ;;  %p3318_p10 = scmp.lt.s32.totalorder %s3316_s25, %s3311_s27 }
  0x50   : > { %p3314_p7 = pnand %p3312_p2, %p3967_p5  ;;  %p3319_p11 = por %p3318_p10, %p3317_p9 }
  0x52   : > { %p3315_p8 = pneg %p3314_p7 }
  0x54   : > { %p3320_p13 = pnand %p3319_p11, %p3315_p8 }
  0x56   : > { %3323 = shalt.err (!%p3320_p13)
}
  0x57   : > { %3104 = dma.hbm_to_vmem [thread:$0]  (!%p3955_p0), %s682_s26, 48, %s684_s2, %s3963_s9  }
  0x58   : > { %s2941_s22 = sshll.u32 %s3759_s24, 6  ;;  %s694_s0 = scalar_lea.vmem [#allocation13], %s2584_s20 }
  0x59   : > { %s702_s17 = sshll.u32 %s694_s0, 4  ;;  %s4516_s6 = sld [smem:[#allocation44_spill]]  ;;  %s703_s17 = int_to_ptr.vmem [resolvable:$true] %s702_s17 }
  0x5a   : > { %s4482_s27 = sshll.u32 %s3952_s29, 7 }
  0x5f   : > { %s699_s23 = scalar_lea.hbm %s4516_s6, %s2941_s22  ;;  %s3346_s20 = scalar_lea.hbm %s4516_s6, 128 }
  0x60   : > { %s700_s28 = sshll.u32 %s699_s23, 4  ;;  %s701_s28 = int_to_ptr.hbm [resolvable:$true] %s700_s28 }
  0x61   : > { %s3339_s4 = sshra.s32 %s701_s28, 4  ;;  %s3340_s4 = int_to_ptr.hbm [resolvable:$true] %s3339_s4 }
  0x62   : > { %s3341_s14 = scalar_lea.hbm %s3340_s4, 64  ;;  %p3347_p9 = scmp.lt.s32.totalorder %s3340_s4, %s4516_s6 }
  0x63   : > { %p3342_p2 = scmp.ne.s32.totalorder %s3340_s4, %s3341_s14  ;;  %p3348_p10 = scmp.lt.s32.totalorder %s3346_s20, %s3341_s14 }
  0x65   : > { %p3344_p7 = pnand %p3342_p2, %p3967_p5  ;;  %p3349_p11 = por %p3348_p10, %p3347_p9 }
  0x67   : > { %p3345_p8 = pneg %p3344_p7 }
  0x69   : > { %p3350_p13 = pnand %p3349_p11, %p3345_p8 }
  0x6b   : > { %3353 = shalt.err (!%p3350_p13)
}
  0x6c   : > { %s4478_s3 = smov 64   ;;  %s4480_s22 = smov 4  }
  0x6d   : > { %3107 = dma.hbm_to_vmem [thread:$0]  (!%p3955_p0), %s701_s28, 1024, %s703_s17, %s3963_s9, %s4478_s3, %s4478_s3, %s4480_s22  }
  0x6e   : > { %s4483_s0 = sshll.u32 %s3759_s24, 7  ;;  %s734_s1 = scalar_lea.vmem [#allocation14], %s4482_s27 }
  0x6f   : > { %s742_s8 = sshll.u32 %s734_s1, 4  ;;  %s4517_s10 = sld [smem:[#allocation48_spill]]  ;;  %s743_s8 = int_to_ptr.vmem [resolvable:$true] %s742_s8 }
  0x70   : > { %s4518_s26 = sld [smem:[#allocation39_spill]] }
  0x75   : > { %s739_s14 = scalar_lea.hbm %s4517_s10, %s4483_s0  ;;  %s3376_s23 = scalar_lea.hbm %s4517_s10, 256 }
  0x76   : > { %s740_s15 = sshll.u32 %s739_s14, 4  ;;  %s566_s25 = sshll.u32 %s4518_s26, 4  ;;  %s741_s15 = int_to_ptr.hbm [resolvable:$true] %s740_s15  ;;  %s567_s25 = int_to_ptr.hbm [resolvable:$true] %s566_s25 }
  0x77   : > { %s3369_s5 = sshra.s32 %s741_s15, 4  ;;  %s3370_s5 = int_to_ptr.hbm [resolvable:$true] %s3369_s5 }
  0x78   : > { %s3371_s17 = scalar_lea.hbm %s3370_s5, 128  ;;  %p3377_p9 = scmp.lt.s32.totalorder %s3370_s5, %s4517_s10 }
  0x79   : > { %p3372_p2 = scmp.ne.s32.totalorder %s3370_s5, %s3371_s17  ;;  %p3378_p10 = scmp.lt.s32.totalorder %s3376_s23, %s3371_s17 }
  0x7b   : > { %p3374_p7 = pnand %p3372_p2, %p3967_p5  ;;  %p3379_p11 = por %p3378_p10, %p3377_p9 }
  0x7d   : > { %p3375_p8 = pneg %p3374_p7 }
  0x7f   : > { %p3380_p13 = pnand %p3379_p11, %p3375_p8 }
  0x81   : > { %3383 = shalt.err (!%p3380_p13)
}
  0x82   : > { %s4519_s14 = smov 8   ;;  %s4520_s2 = smov 128  }
  0x83   : > { %3110 = dma.hbm_to_vmem [thread:$0]  (!%p3955_p0), %s741_s15, 2048, %s743_s8, %s3963_s9, %s4520_s2, %s4520_s2, %s4519_s14  }
  0x84   : > { %s3768_s20 = smov [#allocation6]   ;;  %s2590_s28 = sshll.u32 %s3952_s29, 1 }
  0x85   : > { %s568_s26 = sshll.u32 %s3768_s20, 4  ;;  %s3769_s5 = smov 16   ;;  %s569_s26 = int_to_ptr.vmem [resolvable:$true] %s568_s26 }
  0x86   : > { %s3770_s3 = smov 1   ;;  %s2591_s17 = sshll.u32 %s3759_s24, 1 }
  0x87   : > { %3082 = dma.hbm_to_vmem [thread:$0]  (!%p3921_p6), %s567_s25, 32, %s569_s26, [#allocation7], %s3769_s5, %s3769_s5, %s3770_s3  }
  0x88   : > { %s4521_s11 = sld [smem:[#allocation49_spill]]  ;;  %s756_s22 = scalar_lea.vmem [#allocation15], %s2590_s28 }
  0x89   : > { %s764_s27 = sshll.u32 %s756_s22, 4  ;;  %s4522_s14 = sld [smem:[#allocation40_spill]]  ;;  %s765_s27 = int_to_ptr.vmem [resolvable:$true] %s764_s27 }
  0x8e   : > { %s760_s4 = scalar_lea.hbm %s4521_s11, %s2591_s17  ;;  %s3436_s5 = scalar_lea.hbm %s4521_s11, 4 }
  0x8f   : > { %s762_s0 = sshll.u32 %s760_s4, 4  ;;  %s581_s2 = sshll.u32 %s4522_s14, 4  ;;  %s763_s0 = int_to_ptr.hbm [resolvable:$true] %s762_s0  ;;  %s582_s2 = int_to_ptr.hbm [resolvable:$true] %s581_s2 }
  0x90   : > { %s3429_s20 = sshra.s32 %s763_s0, 4  ;;  %s3430_s20 = int_to_ptr.hbm [resolvable:$true] %s3429_s20 }
  0x91   : > { %s3431_s6 = scalar_lea.hbm %s3430_s20, 2  ;;  %p3437_p9 = scmp.lt.s32.totalorder %s3430_s20, %s4521_s11 }
  0x92   : > { %p3432_p2 = scmp.ne.s32.totalorder %s3430_s20, %s3431_s6  ;;  %p3438_p10 = scmp.lt.s32.totalorder %s3436_s5, %s3431_s6 }
  0x94   : > { %p3434_p7 = pnand %p3432_p2, %p3967_p5  ;;  %p3439_p11 = por %p3438_p10, %p3437_p9 }
  0x96   : > { %p3435_p8 = pneg %p3434_p7 }
  0x98   : > { %p3440_p13 = pnand %p3439_p11, %p3435_p8 }
  0x9a   : > { %3443 = shalt.err (!%p3440_p13)
}
  0x9b   : > { %3113 = dma.hbm_to_vmem [thread:$0]  (!%p3955_p0), %s763_s0, 32, %s765_s27, %s3963_s9  }
  0x9c   : > { %s3771_s3 = smov [#allocation8]   ;;  %s4523_s4 = sld [smem:[#allocation41_spill]] }
  0x9d   : > { %s583_s17 = sshll.u32 %s3771_s3, 4  ;;  %s3772_s6 = smov [#allocation9]   ;;  %s584_s17 = int_to_ptr.vmem [resolvable:$true] %s583_s17 }
  0x9e   : > { %3085 = dma.hbm_to_vmem [thread:$0]  (!%p3921_p6), %s582_s2, 16, %s584_s17, [#allocation7]  }
  0x9f   : > { %s595_s15 = sshll.u32 %s3772_s6, 4  ;;  %s4524_s14 = sshll.u32 %s3759_s24, 7  ;;  %s596_s15 = int_to_ptr.vmem [resolvable:$true] %s595_s15 }
  0xa0   : > { %s4525_s12 = sld [smem:[#allocation50_spill]]  ;;  %s4526_s0 = sshll.u32 %s3952_s29, 7 }
  0xa1   : > { %s775_s5 = scalar_lea.vmem [#allocation16], %s4526_s0  ;;  %s604_s2 = sshll.u32 %s4460_s16, 4  ;;  %s605_s2 = int_to_ptr.hbm [resolvable:$true] %s604_s2 }
  0xa2   : > { %s593_s8 = sshll.u32 %s4523_s4, 4  ;;  %s783_s28 = sshll.u32 %s775_s5, 4  ;;  %s594_s8 = int_to_ptr.hbm [resolvable:$true] %s593_s8  ;;  %s784_s28 = int_to_ptr.vmem [resolvable:$true] %s783_s28 }
  0xa3   : > { %3088 = dma.hbm_to_vmem [thread:$0]  (!%p3921_p6), %s594_s8, 16, %s596_s15, [#allocation10]  }
  0xa6   : > { %s780_s26 = scalar_lea.hbm %s4525_s12, %s4524_s14  ;;  %s3526_s8 = scalar_lea.hbm %s4525_s12, 256 }
  0xa7   : > { %s781_s27 = sshll.u32 %s780_s26, 4  ;;  %s782_s27 = int_to_ptr.hbm [resolvable:$true] %s781_s27 }
  0xa8   : > { %s3519_s17 = sshra.s32 %s782_s27, 4  ;;  %s3520_s17 = int_to_ptr.hbm [resolvable:$true] %s3519_s17 }
  0xa9   : > { %s3521_s1 = scalar_lea.hbm %s3520_s17, 128  ;;  %p3527_p9 = scmp.lt.s32.totalorder %s3520_s17, %s4525_s12 }
  0xaa   : > { %p3522_p2 = scmp.ne.s32.totalorder %s3520_s17, %s3521_s1  ;;  %p3528_p10 = scmp.lt.s32.totalorder %s3526_s8, %s3521_s1 }
  0xac   : > { %p3524_p7 = pnand %p3522_p2, %p3967_p5  ;;  %p3529_p11 = por %p3528_p10, %p3527_p9 }
  0xae   : > { %p3525_p8 = pneg %p3524_p7 }
  0xb0   : > { %p3530_p13 = pnand %p3529_p11, %p3525_p8 }
  0xb2   : > { %3533 = shalt.err (!%p3530_p13)
}
  0xb3   : > { %s4527_s14 = smov 4   ;;  %s4528_s20 = smov 64  }
  0xb4   : > { %3116 = dma.hbm_to_vmem [thread:$0]  (!%p3955_p0), %s782_s27, 2048, %s784_s28, %s3963_s9, %s4528_s20, %s4528_s20, %s4527_s14  }
  0xb5   : > { %s3773_s25 = smov [#allocation18]   ;;  %s621_s22 = sshll.u32 %s4462_s18, 4  ;;  %s622_s22 = int_to_ptr.hbm [resolvable:$true] %s621_s22 }
  0xb6   : > { %s606_s26 = sshll.u32 %s3773_s25, 4  ;;  %s636_s27 = sshll.u32 %s4463_s19, 4  ;;  %s607_s26 = int_to_ptr.vmem [resolvable:$true] %s606_s26  ;;  %s637_s27 = int_to_ptr.hbm [resolvable:$true] %s636_s27 }
  0xb7   : > { %3091 = dma.hbm_to_vmem [thread:$0]  (!%p3921_p6), %s605_s2, 1024, %s607_s26, [#allocation7], %s4528_s20, %s4528_s20, %s4527_s14  }
  0xb8   : > { %s3774_s28 = smov [#allocation19]   ;;  %s3775_s23 = smov [#allocation20]  }
  0xb9   : > { %s623_s1 = sshll.u32 %s3774_s28, 4  ;;  %s638_s4 = sshll.u32 %s3775_s23, 4  ;;  %s624_s1 = int_to_ptr.vmem [resolvable:$true] %s623_s1  ;;  %s639_s4 = int_to_ptr.vmem [resolvable:$true] %s638_s4 }
  0xba   : > { %3094 = dma.hbm_to_vmem [thread:$0]  (!%p3921_p6), %s622_s22, 1024, %s624_s1, [#allocation10], %s4528_s20, %s4528_s20, %s4527_s14  }
  0xbb   : > { %s799_s2 = scalar_lea.hbm %s4457_s13, %s3759_s24  ;;  %s796_s25 = scalar_lea.vmem [#allocation17], %s3952_s29 }
  0xbc   : > { %3097 = dma.hbm_to_vmem [thread:$0]  (!%p3921_p6), %s637_s27, 16, %s639_s4, [#allocation21]  }
  0xbd   : > { %s801_s15 = sshll.u32 %s799_s2, 4  ;;  %s803_s26 = sshll.u32 %s796_s25, 4  ;;  %s802_s15 = int_to_ptr.hbm [resolvable:$true] %s801_s15  ;;  %s804_s26 = int_to_ptr.vmem [resolvable:$true] %s803_s26 }
  0xbe   : > { %s3639_s0 = sshra.s32 %s802_s15, 4  ;;  %s3646_s22 = scalar_lea.hbm %s4457_s13, 2  ;;  %s3640_s0 = int_to_ptr.hbm [resolvable:$true] %s3639_s0 }
  0xbf   : > { %s3641_s5 = scalar_lea.hbm %s3640_s0, 1  ;;  %p3647_p6 = scmp.lt.s32.totalorder %s3640_s0, %s4457_s13 }
  0xc0   : > { %p3642_p2 = scmp.ne.s32.totalorder %s3640_s0, %s3641_s5  ;;  %p3648_p9 = scmp.lt.s32.totalorder %s3646_s22, %s3641_s5 }
  0xc2   : > { %p3644_p7 = pnand %p3642_p2, %p3967_p5  ;;  %p3649_p10 = por %p3648_p9, %p3647_p6 }
  0xc4   : > { %p3645_p8 = pneg %p3644_p7 }
  0xc6   : > { %p3650_p11 = pnand %p3649_p10, %p3645_p8 }
  0xc8   : > { %3653 = shalt.err (!%p3650_p11)
}
  0xc9   : > { %3119 = dma.hbm_to_vmem [thread:$0]  (!%p3955_p0), %s802_s15, 16, %s804_s26, %s3963_s9  }
  0xca   : > { %824 = sbr.rel (%p3913_p4) target bundleno = 2772 (0xad4), region = 100  ;;  %s4530_s7 = sld [smem:[#allocation33_spill]] (!%p3913_p4) }
  0xcf   : > { %3714 = dma.done.wait (%p140_p1), [#allocation4], 256  }
  0xd0   : > { %3716 = vsyncadd (%p140_p1), [#allocation4], 4294967040 }
  0xd1   : > { %3718 = dma.done.wait (%p140_p1), [#allocation7], 48  }
  0xd2   : > { %3720 = vsyncadd (%p140_p1), [#allocation7], 4294967248 }
  0xd3   : > { %3722 = dma.done.wait (%p140_p1), [#allocation10], 16  }
  0xd4   : > { %3724 = vsyncadd (%p140_p1), [#allocation10], 4294967280  ;;  %s4531_s9 = sld [smem:[#allocation31_spill]]  ;;  %s846_s29 = sand.u32 1, %s4530_s7  }
  0xd5   : > { %s847_s28 = scalar_lea.sflag [#allocation4], %s846_s29 }
  0xda   : > { %s4145_s17 = sand.u32 1, %s4531_s9  }
  0xdb   : > { %s3028_s27 = smul.u32 192, %s4145_s17 }
  0xdd   : > { %s4148_s1 = scalar_lea.vmem [#allocation11], %s3028_s27 }
  0xde   : > { %3726 = dma.done.wait (%p3945_p12), %s847_s28, 8288  }
  0xdf   : > { %3728 = vsyncadd (%p3945_p12), %s847_s28, 4294959008  ;;  %s3029_s23 = smul.u32 3, %s4145_s17  ;;  %s2600_s4 = sshll.u32 %s4145_s17, 6 }
  0xe0   : > { %s2601_s8 = sshll.u32 %s4145_s17, 7  ;;  %s2602_s6 = sshll.u32 %s4145_s17, 1 }
  0xe1   : > { %s4158_s2 = scalar_lea.vmem [#allocation12], %s3029_s23  ;;  %s4160_s15 = scalar_lea.vmem [#allocation13], %s2600_s4 }
  0xe2   : > { %s4162_s25 = scalar_lea.vmem [#allocation14], %s2601_s8  ;;  %s4164_s26 = scalar_lea.vmem [#allocation15], %s2602_s6 }
  0xe3   : > { %s4166_s0 = scalar_lea.vmem [#allocation16], %s2601_s8 }
  0xe4   : > { %3730 = dma.done.wait (%p140_p1), [#allocation7], 1024  }
  0xe5   : > { %3732 = vsyncadd (%p140_p1), [#allocation7], 4294966272 }
  0xe6   : > { %3734 = dma.done.wait (%p140_p1), [#allocation10], 1024  }
  0xe7   : > { %3736 = vsyncadd (%p140_p1), [#allocation10], 4294966272 }
  0xe8   : > { %3738 = dma.done.wait (%p140_p1), [#allocation21], 16  }
  0xe9   : > { %3740 = vsyncadd (%p140_p1), [#allocation21], 4294967280  ;;  %p1021_p4 = scmp.lt.s32.totalorder %s4530_s7, 1  ;;  %s4533_s3 = sld [smem:[#allocation45_spill]] }
  0xea   : > { %s4534_s21 = sld [smem:[#allocation46_spill]] }
  0xeb   : > { %s4183_s14 = scalar_select %p1021_p4, %s4530_s7, 1 }
  0xec   : > { %s4535_s23 = sld [smem:[#allocation47_spill]] }
  0xed   : > { %s4536_s5 = sld [smem:[#allocation51_spill]] }
  0xee   : > { %s4537_s20 = sld [smem:[#allocation52_spill]] }
  0xef   : > { %s1023_s24 = scalar_lea.vmem %s4533_s3, %s4183_s14 }
  0xf0   : > { %s1026_s29 = scalar_lea.vmem %s4534_s21, %s4183_s14  ;;  %1040 = sbr.rel (%p2575_p3) target bundleno = 521 (0x209), region = 160 }
  0xf2   : > { %s1029_s4 = scalar_lea.vmem %s4535_s23, %s4183_s14 }
  0xf3   : > { %s1032_s10 = scalar_lea.vmem %s4536_s5, %s4183_s14 }
  0xf4   : > { %s1035_s22 = scalar_lea.vmem %s4537_s20, %s4183_s14 }
  0xf5   : > { %v1041_v0 = vld [vmem:[#allocation3] sm:$0xff]  ;;  %v1042_v1 = vld [vmem:[#allocation3 + $0x8] sm:$0xff]  ;;  %v3776_v2 = vmov 128.0   ;;  %v3188_v31 = vld [vmem:[#allocation8] ss:$0 sm:$0xff] }
  0xf6   : > { %1045 = vadd.xlane.f32.xlu0 %v1041_v0  ;;  %3190 = vrcp.f32 %v3776_v2  ;;  %v3189_v34 = vld [vmem:[#allocation9] ss:$0 sm:$0xff] }
  0xfc   : > { %v3191_v3 = vpop.eup %3190 }
  0xfd   : > { %v1050_v4 = vmul.f32 128.0, %v3191_v3  ;;  %vm1054_vm0 = vweird.f32 %v3191_v3 }
  0xfe   : > { %1047 = vadd.xlane.f32.xlu0 %v1042_v1 }
  0xff   : > { %v1051_v5 = vsub.f32 1.0, %v1050_v4 }
 0x101   : > { %v1052_v6 = vmul.f32 %v3191_v3, %v1051_v5 }
 0x103   : > { %v1053_v7 = vadd.f32 %v3191_v3, %v1052_v6 }
 0x105   : > { %v1055_v8 = vsel %vm1054_vm0, %v3191_v3, %v1053_v7 }
 0x169   : > { %v1046_v9 = vpop.xlane.xlu0 %1045 }
 0x16a   : > { %v1056_v10 = vmul.f32 %v1055_v8, %v1046_v9 }
 0x16c   : > { %v1058_v11 = vsub.f32 %v1041_v0, %v1056_v10 }
 0x16e   : > { %v1060_v12 = vmul.f32 %v1058_v11, %v1058_v11 }
 0x170   : > { %1062 = vadd.xlane.f32.xlu1 %v1060_v12 }
 0x171   : > { %v1048_v13 = vpop.xlane.xlu0 %1047 }
 0x172   : > { %v1057_v14 = vmul.f32 %v1055_v8, %v1048_v13 }
 0x174   : > { %v1059_v15 = vsub.f32 %v1042_v1, %v1057_v14 }
 0x176   : > { %v1061_v16 = vmul.f32 %v1059_v15, %v1059_v15 }
 0x178   : > { %1064 = vadd.xlane.f32.xlu1 %v1061_v16 }
 0x1e3   : > { %v1063_v17 = vpop.xlane.xlu1 %1062 }
 0x1e4   : > { %v1066_v18 = vmul.f32 %v1063_v17, %v1055_v8 }
 0x1e6   : > { %v1068_v19 = vadd.f32 1e-12, %v1066_v18 }
 0x1e8   : > { %3192 = vrsqrt.f32 %v1068_v19  ;;  %vm1076_vm2 = vweird.f32 %v1068_v19 }
 0x1eb   : > { %v1065_v20 = vpop.xlane.xlu1 %1064 }
 0x1ec   : > { %v1067_v21 = vmul.f32 %v1065_v20, %v1055_v8 }
 0x1ee   : > { %v3193_v22 = vpop.eup %3192  ;;  %v1069_v23 = vadd.f32 1e-12, %v1067_v21 }
 0x1ef   : > { %v1071_v24 = vmul.f32 %v3193_v22, %v1068_v19  ;;  %vm1077_vm1 = vweird.f32 %v3193_v22 }
 0x1f0   : > { %3194 = vrsqrt.f32 %v1069_v23  ;;  %vm1078_vm3 = vmor %vm1076_vm2, %vm1077_vm1  ;;  %vm1086_vm5 = vweird.f32 %v1069_v23 }
 0x1f1   : > { %v1072_v25 = vmul.f32 %v3193_v22, %v1071_v24 }
 0x1f3   : > { %v1073_v26 = vmul.f32 0.5, %v1072_v25 }
 0x1f5   : > { %v1074_v27 = vsub.f32 1.5, %v1073_v26 }
 0x1f6   : > { %v3195_v28 = vpop.eup %3194 }
 0x1f7   : > { %v1075_v29 = vmul.f32 %v3193_v22, %v1074_v27  ;;  %v1081_v30 = vmul.f32 %v3195_v28, %v1069_v23  ;;  %vm1087_vm4 = vweird.f32 %v3195_v28 }
 0x1f8   : > { %vm1088_vm6 = vmor %vm1086_vm5, %vm1087_vm4 }
 0x1f9   : > { %v1079_v32 = vsel %vm1078_vm3, %v3193_v22, %v1075_v29  ;;  %v1082_v33 = vmul.f32 %v3195_v28, %v1081_v30 }
 0x1fa   : > { %v1090_v35 = vmul.f32 %v1079_v32, %v1058_v11 }
 0x1fb   : > { %v1083_v36 = vmul.f32 0.5, %v1082_v33 }
 0x1fc   : > { %v1095_v37 = vmul.f32 %v3188_v31, %v1090_v35 }
 0x1fd   : > { %v1084_v38 = vsub.f32 1.5, %v1083_v36 }
 0x1fe   : > { %v1100_v39 = vadd.f32 %v3189_v34, %v1095_v37 }
 0x1ff   : > { %v1085_v40 = vmul.f32 %v3195_v28, %v1084_v38 }
 0x200   : > { %1102 = vst [vmem:[#allocation2] sm:$0xff] %v1100_v39 }
 0x201   : > { %v1089_v41 = vsel %vm1088_vm6, %v3195_v28, %v1085_v40 }
 0x202   : > { %v1091_v42 = vmul.f32 %v1089_v41, %v1059_v15 }
 0x204   : > { %v1096_v43 = vmul.f32 %v3188_v31, %v1091_v42 }
 0x206   : > { %v1101_v44 = vadd.f32 %v3189_v34, %v1096_v43 }
 0x208   : > { %1103 = vst [vmem:[#allocation2 + $0x8] sm:$0xff] %v1101_v44 }
 0x209 PF: > { %v2694_v45 = vld [vmem:[%s4148_s1 + $0xa8] sm:$0xf]  ;;  %v2966_v46 = vld [vmem:[%s4148_s1 + $0xb0] sm:$0xf0]  ;;  %v2965_v47 = vld [vmem:[%s4148_s1 + $0xac] sm:$0xf] }
 0x20a   : > { %v2695_v48 = vor.u32 %v2966_v46, %v2694_v45  ;;  %v2696_v49 = vld [vmem:[%s4148_s1 + $0xb4] sm:$0xf0]  ;;  %v2682_v50 = vld [vmem:[%s4148_s1 + $0x90] sm:$0xf]  ;;  %v2963_v51 = vld [vmem:[%s4148_s1 + $0x98] sm:$0xf0] }
 0x20b   : > { %v2699_v52 = vor.u32 %v2965_v47, %v2696_v49  ;;  %v2962_v53 = vld [vmem:[%s4148_s1 + $0x94] sm:$0xf]  ;;  %v2684_v54 = vld [vmem:[%s4148_s1 + $0x9c] sm:$0xf0]  ;;  %v2683_v55 = vor.u32 %v2963_v51, %v2682_v50  ;;  %v2670_v57 = vld [vmem:[%s4148_s1 + $0x78] sm:$0xf] }
 0x20c   : > { %1275 = vmatpush.bf16.msra.mxu0 %v2695_v48  ;;  %v2687_v56 = vor.u32 %v2962_v53, %v2684_v54  ;;  %v2960_v58 = vld [vmem:[%s4148_s1 + $0x80] sm:$0xf0]  ;;  %v2959_v59 = vld [vmem:[%s4148_s1 + $0x7c] sm:$0xf]  ;;  %v2672_v60 = vld [vmem:[%s4148_s1 + $0x84] sm:$0xf0] }
 0x20d   : > { %1289 = vmatpush.bf16.msra.mxu1 %v2699_v52  ;;  %v2671_v61 = vor.u32 %v2960_v58, %v2670_v57  ;;  %v2675_v62 = vor.u32 %v2959_v59, %v2672_v60  ;;  %v2658_v63 = vld [vmem:[%s4148_s1 + $0x60] sm:$0xf]  ;;  %v2957_v0 = vld [vmem:[%s4148_s1 + $0x68] sm:$0xf0]  ;;  %v2956_v1 = vld [vmem:[%s4148_s1 + $0x64] sm:$0xf] }
 0x20e   : > { %v2660_v2 = vld [vmem:[%s4148_s1 + $0x6c] sm:$0xf0]  ;;  %v2646_v3 = vld [vmem:[%s4148_s1 + $0x48] sm:$0xf]  ;;  %v2659_v4 = vor.u32 %v2957_v0, %v2658_v63  ;;  %v2954_v5 = vld [vmem:[%s4148_s1 + $0x50] sm:$0xf0] }
 0x20f   : > { %v2953_v6 = vld [vmem:[%s4148_s1 + $0x4c] sm:$0xf]  ;;  %v2663_v7 = vor.u32 %v2956_v1, %v2660_v2  ;;  %v2648_v8 = vld [vmem:[%s4148_s1 + $0x54] sm:$0xf0]  ;;  %v2647_v9 = vor.u32 %v2954_v5, %v2646_v3  ;;  %v2634_v11 = vld [vmem:[%s4148_s1 + $0x30] sm:$0xf] }
 0x210   : > { %1276 = vmatpush.bf16.msra.mxu0 %v2683_v55  ;;  %v2651_v10 = vor.u32 %v2953_v6, %v2648_v8  ;;  %v2951_v12 = vld [vmem:[%s4148_s1 + $0x38] sm:$0xf0]  ;;  %v2950_v13 = vld [vmem:[%s4148_s1 + $0x34] sm:$0xf]  ;;  %v2636_v14 = vld [vmem:[%s4148_s1 + $0x3c] sm:$0xf0] }
 0x211   : > { %1290 = vmatpush.bf16.msra.mxu1 %v2687_v56  ;;  %v2635_v15 = vor.u32 %v2951_v12, %v2634_v11  ;;  %v2639_v16 = vor.u32 %v2950_v13, %v2636_v14  ;;  %v2622_v17 = vld [vmem:[%s4148_s1 + $0x18] sm:$0xf]  ;;  %v2948_v18 = vld [vmem:[%s4148_s1 + $0x20] sm:$0xf0]  ;;  %v2947_v19 = vld [vmem:[%s4148_s1 + $0x1c] sm:$0xf] }
 0x212   : > { %v2624_v20 = vld [vmem:[%s4148_s1 + $0x24] sm:$0xf0]  ;;  %v2623_v21 = vor.u32 %v2948_v18, %v2622_v17  ;;  %v2610_v23 = vld [vmem:[%s4148_s1] sm:$0xf]  ;;  %v2945_v24 = vld [vmem:[%s4148_s1 + $0x8] sm:$0xf0] }
 0x213   : > { %v2627_v22 = vor.u32 %v2947_v19, %v2624_v20  ;;  %v2944_v25 = vld [vmem:[%s4148_s1 + $0x4] sm:$0xf]  ;;  %v2612_v26 = vld [vmem:[%s4148_s1 + $0xc] sm:$0xf0]  ;;  %v2611_v27 = vor.u32 %v2945_v24, %v2610_v23  ;;  %v4239_v28 = vld [vmem:[#allocation2] sm:$0xff]  ;;  %vm1325_vm7 = vcmask 523264  }
 0x214   : > { %1277 = vmatpush.bf16.msra.mxu0 %v2671_v61  ;;  %v4241_v29 = vld [vmem:[#allocation2 + $0x8] sm:$0xff]  ;;  %v2615_v30 = vor.u32 %v2944_v25, %v2612_v26  ;;  %v2702_v35 = vld [vmem:[%s4148_s1 + $0xb0] sm:$0xf]  ;;  %v2967_v36 = vld [vmem:[%s4148_s1 + $0xb8] sm:$0xf0]  ;;  %s3777_s11 = smov 64  }
 0x215   : > { %1291 = vmatpush.bf16.msra.mxu1 %v2675_v62  ;;  %v4245_v31 = vpack.c.bf16 %v4241_v29, %v4239_v28  ;;  %v4250_v32 = vld [vmem:[%s4158_s2] sm:$0x7]  ;;  %v2690_v37 = vld [vmem:[%s4148_s1 + $0x98] sm:$0xf]  ;;  %v2703_v38 = vor.u32 %v2967_v36, %v2702_v35  ;;  %v2961_v46 = vld [vmem:[%s4148_s1 + $0x88] sm:$0xf0] }
 0x216   : > { %v1141_v33 = vperm.slane %v4250_v32, 0  ;;  %v1142_v34 = vperm.slane %v4250_v32, 1  ;;  %v2964_v39 = vld [vmem:[%s4148_s1 + $0xa0] sm:$0xf0]  ;;  %v2678_v45 = vld [vmem:[%s4148_s1 + $0x80] sm:$0xf] }
 0x217   : > { %1303 = vmatpush.bf16.msra.mxu2 %v2703_v38  ;;  %v2691_v42 = vor.u32 %v2964_v39, %v2690_v37  ;;  %v2679_v48 = vor.u32 %v2961_v46, %v2678_v45  ;;  %v2666_v52 = vld [vmem:[%s4148_s1 + $0x68] sm:$0xf]  ;;  %v2958_v53 = vld [vmem:[%s4148_s1 + $0x70] sm:$0xf0]  ;;  %v2654_v60 = vld [vmem:[%s4148_s1 + $0x50] sm:$0xf] }
 0x218   : > { %1278 = vmatpush.bf16.msra.mxu0 %v2659_v4  ;;  %v2667_v57 = vor.u32 %v2958_v53, %v2666_v52  ;;  %v2955_v61 = vld [vmem:[%s4148_s1 + $0x58] sm:$0xf0]  ;;  %v2642_v4 = vld [vmem:[%s4148_s1 + $0x38] sm:$0xf]  ;;  %v2952_v5 = vld [vmem:[%s4148_s1 + $0x40] sm:$0xf0] }
 0x219   : > { %1292 = vmatpush.bf16.msra.mxu1 %v2663_v7  ;;  %v2655_v0 = vor.u32 %v2955_v61, %v2654_v60  ;;  %v2643_v8 = vor.u32 %v2952_v5, %v2642_v4  ;;  %v2618_v13 = vld [vmem:[%s4148_s1 + $0x8] sm:$0xf]  ;;  %v2946_v14 = vld [vmem:[%s4148_s1 + $0x10] sm:$0xf0]  ;;  %vm1374_vm8 = vcmask 64512   ;;  %vm1402_vm9 = vcmask 1043456  }
 0x21b   : > { %1304 = vmatpush.bf16.msra.mxu2 %v2691_v42 }
 0x21c   : > { %1279 = vmatpush.bf16.msra.mxu0 %v2647_v9  ;;  %v2630_v9 = vld [vmem:[%s4148_s1 + $0x20] sm:$0xf] }
 0x21d   : > { %1293 = vmatpush.bf16.msra.mxu1 %v2651_v10  ;;  %v2949_v10 = vld [vmem:[%s4148_s1 + $0x28] sm:$0xf0] }
 0x21e   : > { %v2631_v12 = vor.u32 %v2949_v10, %v2630_v9 }
 0x21f   : > { %1305 = vmatpush.bf16.msra.mxu2 %v2679_v48 }
 0x220   : > { %1280 = vmatpush.bf16.msra.mxu0 %v2635_v15 }
 0x221   : > { %1294 = vmatpush.bf16.msra.mxu1 %v2639_v16  ;;  %v2619_v16 = vor.u32 %v2946_v14, %v2618_v13 }
 0x223   : > { %1306 = vmatpush.bf16.msra.mxu2 %v2667_v57 }
 0x224   : > { %1281 = vmatpush.bf16.msra.mxu0 %v2623_v21 }
 0x225   : > { %1295 = vmatpush.bf16.msra.mxu1 %v2627_v22  ;;  %v3201_v22 = vld [vmem:[#allocation6] ss:$0 sm:$0xff] }
 0x227   : > { %1307 = vmatpush.bf16.msra.mxu2 %v2655_v0 }
 0x228   : > { %1282 = vmatpush.bf16.msra.mxu0 %v2611_v27 }
 0x229   : > { %1296 = vmatpush.bf16.msra.mxu1 %v2615_v30 }
 0x22b   : > { %1283 = vmatmul.bf16.vlgmr.msra.gmra.mxu0 %v4245_v31  ;;  %1308 = vmatpush.bf16.msra.mxu2 %v2643_v8 }
 0x22c   : > { %1297 = vmatmul.bf16.vlgmr.msra.gmra.mxu1 %v4245_v31 }
 0x22f   : > { %1309 = vmatpush.bf16.msra.mxu2 %v2631_v12 }
 0x233   : > { %1310 = vmatpush.bf16.msra.mxu2 %v2619_v16 }
 0x236   : > { %1311 = vmatmul.bf16.vlgmr.msra.gmra.mxu2 %v4245_v31  ;;  %v3202_v31 = vld [vmem:[#allocation6 + $0x1] ss:$0 sm:$0xff] }
 0x2a8   : > { %v1284_v40 = vpop.f32.mrf.mxu0 }
 0x2a9   : > { %v1298_v41 = vpop.f32.mrf.mxu1  ;;  %v1285_v43 = vadd.f32 %v1284_v40, %v1141_v33 }
 0x2aa   : > { %v1299_v44 = vadd.f32 %v1298_v41, %v1142_v34 }
 0x2ab   : > { %v1319_v49 = vpack.c.bf16 %v1285_v43, %v1285_v43 }
 0x2ac   : > { %v1321_v47 = vpack.c.bf16 %v1299_v44, %v1299_v44 }
 0x2ad   : > { %v1439_v58 = vunpack.c.l.b16 %v1319_v49 }
 0x2ae   : > { %v1330_v50 = vsel %vm1325_vm7, %v1321_v47, 0  ;;  %v1444_v51 = vunpack.c.l.b16 %v1321_v47 }
 0x2af   : > { %1339 = vmatpush.bf16.xpose.msra.mxu3 %v1330_v50  ;;  %v1440_v1 = vpack.c.b16 %v1439_v58, %v1439_v58 }
 0x2b0   : > { %v1445_v54 = vpack.c.b16 %v1444_v51, %v1444_v51  ;;  %v1286_v55 = vpop.f32.mrf.mxu0 }
 0x2b1   : > { %v1300_v56 = vpop.f32.mrf.mxu1  ;;  %v1287_v62 = vadd.f32 %v1286_v55, %v1141_v33  ;;  %v1143_v33 = vperm.slane %v4250_v32, 2 }
 0x2b2   : > { %v1301_v59 = vadd.f32 %v1300_v56, %v1142_v34  ;;  %1446 = vrot.lane.b32.xlu0 %v1445_v54, %s3777_s11 }
 0x2b3   : > { %v1320_v6 = vpack.c.bf16 %v1287_v62, %v1287_v62 }
 0x2b4   : > { %v1322_v63 = vpack.c.bf16 %v1301_v59, %v1301_v59 }
 0x2b5   : > { %v1468_v11 = vunpack.c.l.b16 %v1320_v6 }
 0x2b6   : > { %2704 = vmatmul.msk.bf16.vlgmr.msra.gmra.mxu3 %vm1325_vm7, %v1319_v49  ;;  %v1349_v2 = vsel %vm1325_vm7, %v1322_v63, 0  ;;  %v1473_v3 = vunpack.c.l.b16 %v1322_v63 }
 0x2b7   : > { %1358 = vmatpush.bf16.xpose.msrb.mxu3 %v1349_v2  ;;  %v1469_v15 = vpack.c.b16 %v1468_v11, %v1468_v11 }
 0x2b8   : > { %v1474_v7 = vpack.c.b16 %v1473_v3, %v1473_v3 }
 0x2b9   : > { %v1312_v36 = vpop.f32.mrf.mxu2 }
 0x2ba   : > { %1475 = vrot.lane.b32.xlu1 %v1474_v7, %s3777_s11  ;;  %1441 = vrot.lane.b32.xlu0 %v1440_v1, %s3777_s11  ;;  %v1313_v38 = vadd.f32 %v1312_v36, %v1143_v33 }
 0x2bc   : > { %v4286_v40 = vpack.c.bf16 %v1313_v38, %v1313_v38 }
 0x2be   : > { %v1404_v41 = vsel %vm1402_vm9, %v4286_v40, 0 }
 0x2bf   : > { %1413 = vmatpush.bf16.msra.mxu3 %v1404_v41 }
 0x2c1   : > { %v1314_v43 = vpop.f32.mrf.mxu2 }
 0x2c2   : > { %1470 = vrot.lane.b32.xlu1 %v1469_v15, %s3777_s11  ;;  %v1315_v44 = vadd.f32 %v1314_v43, %v1143_v33  ;;  %v2975_v43 = vld [vmem:[%s4160_s15 + $0x38] sm:$0xff] }
 0x2c3   : > { %1651 = vmatpush.bf16.msrb.mxu1 %v2975_v43 }
 0x2c4   : > { %v1324_v45 = vpack.c.bf16 %v1315_v44, %v1315_v44  ;;  %v2974_v44 = vld [vmem:[%s4160_s15 + $0x30] sm:$0xff] }
 0x2c6   : > { %2705 = vmatmul.msk.bf16.vlgmr.msrb.gmra.mxu3 %vm1325_vm7, %v1320_v6  ;;  %v1423_v32 = vsel %vm1402_vm9, %v1324_v45, 0  ;;  %v1549_v61 = vunpack.c.l.b16 %v1324_v45  ;;  %v2973_v45 = vld [vmem:[%s4160_s15 + $0x28] sm:$0xff] }
 0x2c7   : > { %1432 = vmatpush.bf16.msrb.mxu0 %v1423_v32  ;;  %1652 = vmatpush.bf16.msrb.mxu1 %v2974_v44  ;;  %v2972_v32 = vld [vmem:[%s4160_s15 + $0x20] sm:$0xff]  ;;  %v2770_v44 = vld [vmem:[%s4162_s25 + $0x30] sm:$0xf] }
 0x2c8   : > { %v1550_v0 = vpack.c.b16 %v1549_v61, %v1549_v61  ;;  %v3203_v61 = vld [vmem:[%s1023_s24] ss:$0 sm:$0xff] }
 0x2cb   : > { %1653 = vmatpush.bf16.msrb.mxu1 %v2973_v45  ;;  %v2983_v45 = vld [vmem:[%s4162_s25 + $0x34] sm:$0xf0] }
 0x2cf   : > { %1654 = vmatpush.bf16.msrb.mxu1 %v2972_v32  ;;  %v2982_v32 = vld [vmem:[%s4162_s25 + $0x34] sm:$0xf] }
 0x324   : > { %v1447_v17 = vpop.permute.xlu0 %1446 }
 0x325   : > { %v1452_v18 = vsel %vm1325_vm7, %v1447_v17, 0 }
 0x326   : > { %1461 = vmatpush.bf16.xpose.msrb.mxu2 %v1452_v18 }
 0x32c   : > { %v1476_v19 = vpop.permute.xlu1 %1475  ;;  %v1442_v20 = vpop.permute.xlu0 %1441 }
 0x32d   : > { %v1481_v21 = vsel %vm1325_vm7, %v1476_v19, 0  ;;  %2708 = vmatmul.msk.bf16.vlgmr.msrb.gmra.mxu2 %vm1325_vm7, %v1442_v20 }
 0x32e   : > { %1490 = vmatpush.bf16.xpose.msra.mxu2 %v1481_v21 }
 0x334   : > { %v1471_v25 = vpop.permute.xlu1 %1470 }
 0x339   : > { %v1341_v23 = vpop.f32.mrf.mxu3 }
 0x33a   : > { %v1364_v24 = vmul.f32 0.125, %v1341_v23 }
 0x33c   : > { %v1372_v26 = vadd.f32 %v3201_v22, %v1364_v24  ;;  %v1525_v24 = vunpack.c.l.b16 %v4286_v40 }
 0x33d   : > { %2709 = vmatmul.msk.bf16.vlgmr.msra.gmra.mxu2 %vm1325_vm7, %v1471_v25 }
 0x33e   : > { %v1375_v27 = vsel %vm1374_vm8, %v1372_v26, -inf  ;;  %v1526_v25 = vpack.c.b16 %v1525_v24, %v1525_v24  ;;  %v2989_v24 = vld [vmem:[%s4162_s25 + $0x64] sm:$0xf0] }
 0x33f   : > { %1376 = vmax.xlane.f32.xlu2 %v1375_v27 }
 0x341   : > { %v1343_v30 = vpop.f32.mrf.mxu3 }
 0x349   : > { %v1360_v34 = vpop.f32.mrf.mxu3 }
 0x34a   : > { %v1365_v35 = vmul.f32 0.125, %v1360_v34 }
 0x34c   : > { %v1373_v37 = vadd.f32 %v3202_v31, %v1365_v35 }
 0x34e   : > { %v1378_v39 = vsel %vm1374_vm8, %v1373_v37, -inf }
 0x34f   : > { %1379 = vmax.xlane.f32.xlu2 %v1378_v39 }
 0x351   : > { %v1362_v42 = vpop.f32.mrf.mxu3 }
 0x3b0   : > { %v1463_v46 = vpop.f32.mrf.mxu2 }
 0x3b1   : > { %v1496_v47 = vmul.f32 0.125, %v1463_v46  ;;  %v2971_v46 = vld [vmem:[%s4160_s15 + $0x18] sm:$0xff] }
 0x3b2   : > { %v1377_v48 = vpop.xlane.xlu2 %1376  ;;  %1655 = vmatpush.bf16.msrb.mxu1 %v2971_v46  ;;  %v2771_v46 = vor.u32 %v2983_v45, %v2770_v44  ;;  %v2994_v44 = vld [vmem:[%s4166_s0 + $0x10] sm:$0xff] }
 0x3b3   : > { %v1381_v49 = vsub.f32 %v1372_v26, %v1377_v48  ;;  %v1498_v50 = vadd.f32 %v3201_v22, %v1496_v47  ;;  %v2970_v48 = vld [vmem:[%s4160_s15 + $0x10] sm:$0xff] }
 0x3b4   : > { %v3002_v45 = vld [vmem:[%s4166_s0 + $0x50] sm:$0xff] }
 0x3b5   : > { %v1383_v51 = vmul.f32 1.442695, %v1381_v49  ;;  %v1500_v52 = vsel %vm1374_vm8, %v1498_v50, -inf  ;;  %v2969_v49 = vld [vmem:[%s4160_s15 + $0x8] sm:$0xff] }
 0x3b6   : > { %1501 = vmax.xlane.f32.xlu0 %v1500_v52  ;;  %1656 = vmatpush.bf16.msrb.mxu1 %v2970_v48 }
 0x3b7   : > { %3209 = vpow2.f32 %v1383_v51 }
 0x3b8   : > { %v1465_v53 = vpop.f32.mrf.mxu2 }
 0x3ba   : > { %1657 = vmatpush.bf16.msrb.mxu1 %v2969_v49  ;;  %v2762_v49 = vld [vmem:[%s4162_s25 + $0x20] sm:$0xf] }
 0x3bd   : > { %v3210_v54 = vpop.eup %3209 }
 0x3be   : > { %v1387_v55 = vsel %vm1374_vm8, %v3210_v54, 0.0 }
 0x3bf   : > { %1388 = vadd.xlane.f32.xlu2 %v1387_v55 }
 0x3c0   : > { %v1492_v56 = vpop.f32.mrf.mxu2 }
 0x3c1   : > { %v1497_v57 = vmul.f32 0.125, %v1492_v56 }
 0x3c2   : > { %v1380_v58 = vpop.xlane.xlu2 %1379 }
 0x3c3   : > { %v1382_v59 = vsub.f32 %v1373_v37, %v1380_v58  ;;  %v1499_v60 = vadd.f32 %v3202_v31, %v1497_v57 }
 0x3c5   : > { %v1385_v62 = vmul.f32 1.442695, %v1382_v59  ;;  %v1503_v63 = vsel %vm1374_vm8, %v1499_v60, -inf }
 0x3c6   : > { %1504 = vmax.xlane.f32.xlu1 %v1503_v63 }
 0x3c7   : > { %3211 = vpow2.f32 %v1385_v62 }
 0x3c8   : > { %v1494_v1 = vpop.f32.mrf.mxu2 }
 0x3ca   : > { %1551 = vrot.lane.b32.xlu0 %v1550_v0, %s3777_s11 }
 0x3cd   : > { %v3212_v2 = vpop.eup %3211 }
 0x3ce   : > { %v1390_v3 = vsel %vm1374_vm8, %v3212_v2, 0.0 }
 0x3cf   : > { %1391 = vadd.xlane.f32.xlu2 %v1390_v3 }
 0x429   : > { %v1502_v4 = vpop.xlane.xlu0 %1501 }
 0x42a   : > { %v1506_v5 = vsub.f32 %v1498_v50, %v1502_v4  ;;  %v3778_v4 = vmov 128.0  }
 0x42c   : > { %v1508_v6 = vmul.f32 1.442695, %v1506_v5 }
 0x42e   : > { %3213 = vpow2.f32 %v1508_v6 }
 0x432   : > { %v1389_v7 = vpop.xlane.xlu2 %1388 }
 0x433   : > { %3215 = vrcp.f32 %v1389_v7 }
 0x434   : > { %v3214_v8 = vpop.eup %3213 }
 0x435   : > { %v1512_v9 = vsel %vm1374_vm8, %v3214_v8, 0.0 }
 0x436   : > { %1513 = vadd.xlane.f32.xlu2 %v1512_v9 }
 0x439   : > { %v3216_v10 = vpop.eup %3215  ;;  %v1505_v11 = vpop.xlane.xlu1 %1504 }
 0x43a   : > { %v1395_v12 = vmul.f32 %v3216_v10, %v3210_v54  ;;  %v1507_v13 = vsub.f32 %v1499_v60, %v1505_v11  ;;  %v2968_v54 = vld [vmem:[%s4160_s15] sm:$0xff] }
 0x43b   : > { %1658 = vmatpush.bf16.msrb.mxu1 %v2968_v54 }
 0x43c   : > { %v1397_v14 = vpack.c.bf16 %v1395_v12, %v1395_v12  ;;  %v1510_v15 = vmul.f32 1.442695, %v1507_v13  ;;  %v1552_v16 = vpop.permute.xlu0 %1551 }
 0x43d   : > { %v1557_v17 = vsel %vm1402_vm9, %v1552_v16, 0 }
 0x43e   : > { %3217 = vpow2.f32 %v1510_v15  ;;  %2706 = vmatmul.msk.bf16.vlgmr.msra.gmra.mxu3 %vm1374_vm8, %v1397_v14  ;;  %1566 = vmatpush.bf16.msra.mxu0 %v1557_v17  ;;  %v2802_v17 = vld [vmem:[%s4162_s25 + $0x70] sm:$0xf] }
 0x442   : > { %v1392_v18 = vpop.xlane.xlu2 %1391 }
 0x443   : > { %3219 = vrcp.f32 %v1392_v18  ;;  %v2991_v18 = vld [vmem:[%s4162_s25 + $0x74] sm:$0xf0] }
 0x444   : > { %v3218_v19 = vpop.eup %3217 }
 0x445   : > { %v1515_v20 = vsel %vm1374_vm8, %v3218_v19, 0.0 }
 0x446   : > { %1516 = vadd.xlane.f32.xlu2 %v1515_v20  ;;  %v2803_v20 = vor.u32 %v2991_v18, %v2802_v17 }
 0x448   : > { %1829 = vmatpush.bf16.msrb.mxu2 %v2803_v20 }
 0x449   : > { %v3220_v21 = vpop.eup %3219 }
 0x44a   : > { %v1396_v22 = vmul.f32 %v3220_v21, %v3212_v2  ;;  %v2804_v21 = vld [vmem:[%s4162_s25 + $0x78] sm:$0xf0] }
 0x44c   : > { %v1398_v23 = vpack.c.bf16 %v1396_v22, %v1396_v22 }
 0x44e   : > { %2707 = vmatmul.msk.bf16.vlgmr.msrb.gmra.mxu0 %vm1374_vm8, %v1398_v23  ;;  %v2794_v23 = vld [vmem:[%s4162_s25 + $0x60] sm:$0xf] }
 0x45e   : > { %1527 = vrot.lane.b32.xlu2 %v1526_v25, %s3777_s11  ;;  %v2988_v25 = vld [vmem:[%s4162_s25 + $0x64] sm:$0xf] }
 0x4a9   : > { %v1514_v26 = vpop.xlane.xlu2 %1513 }
 0x4aa   : > { %3221 = vrcp.f32 %v1514_v26  ;;  %v2795_v26 = vor.u32 %v2989_v24, %v2794_v23  ;;  %v3204_v23 = vld [vmem:[%s1026_s29] ss:$0 sm:$0xff] }
 0x4ac   : > { %1830 = vmatpush.bf16.msrb.mxu2 %v2795_v26 }
 0x4b0   : > { %v3222_v30 = vpop.eup %3221 }
 0x4b1   : > { %v1520_v33 = vmul.f32 %v3222_v30, %v3214_v8 }
 0x4b3   : > { %v1522_v39 = vpack.c.bf16 %v1520_v33, %v1520_v33  ;;  %v2987_v33 = vld [vmem:[%s4162_s25 + $0x54] sm:$0xf0] }
 0x4b9   : > { %v1517_v27 = vpop.xlane.xlu2 %1516 }
 0x4ba   : > { %3223 = vrcp.f32 %v1517_v27  ;;  %v2796_v27 = vld [vmem:[%s4162_s25 + $0x68] sm:$0xf0] }
 0x4bb   : > { %3225 = vrcp.f32 %v3778_v4  ;;  %v2799_v30 = vor.u32 %v2988_v25, %v2796_v27 }
 0x4c0   : > { %v3224_v31 = vpop.eup %3223 }
 0x4c1   : > { %v1521_v34 = vmul.f32 %v3224_v31, %v3218_v19  ;;  %v1528_v35 = vpop.permute.xlu2 %1527  ;;  %v1415_v36 = vpop.f32.mrf.mxu3  ;;  %v2990_v19 = vld [vmem:[%s4162_s25 + $0x74] sm:$0xf]  ;;  %v2786_v31 = vld [vmem:[%s4162_s25 + $0x50] sm:$0xf] }
 0x4c2   : > { %v1533_v37 = vsel %vm1402_vm9, %v1528_v35, 0  ;;  %v3226_v5 = vpop.eup %3225  ;;  %v2807_v22 = vor.u32 %v2990_v19, %v2804_v21  ;;  %v2787_v35 = vor.u32 %v2987_v33, %v2786_v31 }
 0x4c3   : > { %v1523_v38 = vpack.c.bf16 %v1521_v34, %v1521_v34  ;;  %1542 = vmatpush.bf16.msrb.mxu3 %v1533_v37  ;;  %v1674_v6 = vmul.f32 128.0, %v3226_v5  ;;  %vm1678_vm10 = vweird.f32 %v3226_v5  ;;  %v2986_v34 = vld [vmem:[%s4162_s25 + $0x54] sm:$0xf] }
 0x4c4   : > { %1831 = vmatpush.bf16.msrb.mxu2 %v2787_v35  ;;  %v3007_v35 = vld [vmem:[%s4166_s0 + $0x78] sm:$0xff] }
 0x4c5   : > { %2711 = vmatmul.msk.bf16.vlgmr.msra.gmra.mxu0 %vm1374_vm8, %v1523_v38  ;;  %v1675_v7 = vsub.f32 1.0, %v1674_v6  ;;  %v2778_v38 = vld [vmem:[%s4162_s25 + $0x40] sm:$0xf]  ;;  %2041 = vmatpush.bf16.msra.mxu1 %v3007_v35 }
 0x4c6   : > { %2710 = vmatmul.msk.bf16.vlgmr.msrb.gmra.mxu3 %vm1374_vm8, %v1522_v39  ;;  %v2985_v39 = vld [vmem:[%s4162_s25 + $0x44] sm:$0xf0] }
 0x4c7   : > { %v1676_v8 = vmul.f32 %v3226_v5, %v1675_v7  ;;  %1843 = vmatpush.bf16.msra.mxu3 %v2807_v22 }
 0x4c9   : > { %v1417_v40 = vpop.f32.mrf.mxu3  ;;  %v1677_v9 = vadd.f32 %v3226_v5, %v1676_v8 }
 0x4ca   : > { %v2984_v40 = vld [vmem:[%s4162_s25 + $0x44] sm:$0xf] }
 0x4cb   : > { %v1434_v41 = vpop.f32.mrf.mxu0  ;;  %v4324_v10 = vsel %vm1678_vm10, %v3226_v5, %v1677_v9  ;;  %1844 = vmatpush.bf16.msra.mxu3 %v2799_v30 }
 0x4d3   : > { %v1436_v42 = vpop.f32.mrf.mxu0 }
 0x4d4   : > { %v2780_v42 = vld [vmem:[%s4162_s25 + $0x48] sm:$0xf0] }
 0x4d5   : > { %v2783_v43 = vor.u32 %v2984_v40, %v2780_v42  ;;  %v2996_v40 = vld [vmem:[%s4166_s0 + $0x20] sm:$0xff]  ;;  %v2995_v42 = vld [vmem:[%s4166_s0 + $0x18] sm:$0xff] }
 0x542   : > { %v1568_v47 = vpop.f32.mrf.mxu0 }
 0x549   : > { %v1544_v50 = vpop.f32.mrf.mxu3 }
 0x54a   : > { %v3196_v51 = vpack.i.bf16 %v1568_v47, %v1544_v50  ;;  %v1570_v52 = vpop.f32.mrf.mxu0  ;;  %v2772_v47 = vld [vmem:[%s4162_s25 + $0x38] sm:$0xf0]  ;;  %v2981_v50 = vld [vmem:[%s4162_s25 + $0x24] sm:$0xf0] }
 0x54b   : > { %v2775_v48 = vor.u32 %v2982_v32, %v2772_v47  ;;  %v2763_v52 = vor.u32 %v2981_v50, %v2762_v49  ;;  %v1743_v32 = vld [vmem:[%s4164_s26] sm:$0x3]  ;;  %v3001_v47 = vld [vmem:[%s4166_s0 + $0x48] sm:$0xff]  ;;  %s4541_s26 = scalar_lea.vmem [#allocation17], %s4145_s17 }
 0x54c   : > { %3197 = vrot.lane.b32.xlu1 %v3196_v51, %s3777_s11  ;;  %v2980_v51 = vld [vmem:[%s4162_s25 + $0x24] sm:$0xf]  ;;  %v1746_v49 = vperm.slane %v1743_v32, 1 }
 0x551   : > { %v1546_v53 = vpop.f32.mrf.mxu3 }
 0x552   : > { %v2764_v53 = vld [vmem:[%s4162_s25 + $0x28] sm:$0xf0] }
 0x553   : > { %v2767_v54 = vor.u32 %v2980_v51, %v2764_v53  ;;  %v3000_v53 = vld [vmem:[%s4166_s0 + $0x40] sm:$0xff] }
 0x5be   : > { %v3198_v55 = vpop.permute.xlu1 %3197 }
 0x5bf   : > { %v3200_v56 = vunpack.i.h.bf16 %v3198_v55  ;;  %v3199_v57 = vunpack.i.l.bf16 %v3198_v55  ;;  %v2754_v55 = vld [vmem:[%s4162_s25 + $0x10] sm:$0xf] }
 0x5c1   : > { %v1580_v58 = vsel %vm1325_vm7, %v1415_v36, %v3199_v57  ;;  %v1581_v59 = vsel %vm1325_vm7, %v1434_v41, %v3200_v56  ;;  %v2788_v36 = vld [vmem:[%s4162_s25 + $0x58] sm:$0xf0]  ;;  %v2779_v41 = vor.u32 %v2985_v39, %v2778_v38  ;;  %v2979_v56 = vld [vmem:[%s4162_s25 + $0x14] sm:$0xf0]  ;;  %v2978_v57 = vld [vmem:[%s4162_s25 + $0x14] sm:$0xf] }
 0x5c2   : > { %v1582_v60 = vpack.c.bf16 %v1581_v59, %v1580_v58  ;;  %v2791_v37 = vor.u32 %v2986_v34, %v2788_v36  ;;  %v2755_v58 = vor.u32 %v2979_v56, %v2754_v55  ;;  %v2756_v59 = vld [vmem:[%s4162_s25 + $0x18] sm:$0xf0]  ;;  %v2998_v36 = vld [vmem:[%s4166_s0 + $0x30] sm:$0xff]  ;;  %v2997_v38 = vld [vmem:[%s4166_s0 + $0x28] sm:$0xff] }
 0x5c3   : > { %1832 = vmatpush.bf16.msrb.mxu2 %v2779_v41  ;;  %v3005_v39 = vld [vmem:[%s4166_s0 + $0x68] sm:$0xff]  ;;  %v3004_v41 = vld [vmem:[%s4166_s0 + $0x60] sm:$0xff] }
 0x5c4   : > { %1659 = vmatmul.bf16.vlgmr.msrb.gmra.mxu1 %v1582_v60  ;;  %1845 = vmatpush.bf16.msra.mxu3 %v2791_v37  ;;  %v2759_v60 = vor.u32 %v2978_v57, %v2756_v59  ;;  %v3006_v37 = vld [vmem:[%s4166_s0 + $0x70] sm:$0xff] }
 0x5c5   : > { %2042 = vmatpush.bf16.msra.mxu1 %v3006_v37 }
 0x5c7   : > { %1833 = vmatpush.bf16.msrb.mxu2 %v2771_v46  ;;  %v2993_v46 = vld [vmem:[%s4166_s0 + $0x8] sm:$0xff] }
 0x5c8   : > { %1846 = vmatpush.bf16.msra.mxu3 %v2783_v43  ;;  %v3003_v43 = vld [vmem:[%s4166_s0 + $0x58] sm:$0xff] }
 0x5c9   : > { %2043 = vmatpush.bf16.msra.mxu1 %v3005_v39 }
 0x5cb   : > { %1834 = vmatpush.bf16.msrb.mxu2 %v2763_v52  ;;  %v2992_v52 = vld [vmem:[%s4166_s0] sm:$0xff] }
 0x5cc   : > { %1847 = vmatpush.bf16.msra.mxu3 %v2775_v48  ;;  %v1745_v48 = vperm.slane %v1743_v32, 0 }
 0x5cd   : > { %2044 = vmatpush.bf16.msra.mxu1 %v3004_v41 }
 0x5cf   : > { %1835 = vmatpush.bf16.msrb.mxu2 %v2755_v58 }
 0x5d0   : > { %1848 = vmatpush.bf16.msra.mxu3 %v2767_v54 }
 0x5d1   : > { %2045 = vmatpush.bf16.msra.mxu1 %v3003_v43 }
 0x5d4   : > { %1849 = vmatpush.bf16.msra.mxu3 %v2759_v60 }
 0x5d5   : > { %2046 = vmatpush.bf16.msra.mxu1 %v3002_v45 }
 0x5d9   : > { %2047 = vmatpush.bf16.msra.mxu1 %v3001_v47 }
 0x5dd   : > { %2048 = vmatpush.bf16.msra.mxu1 %v3000_v53 }
 0x641   : > { %v1660_v62 = vpop.f32.mrf.mxu1 }
 0x642   : > { %v1661_v63 = vadd.f32 %v3203_v61, %v1660_v62  ;;  %v2977_v62 = vld [vmem:[%s4162_s25 + $0x4] sm:$0xf0] }
 0x644   : > { %v1665_v0 = vadd.f32 %v1661_v63, %v4239_v28  ;;  %v2976_v63 = vld [vmem:[%s4162_s25 + $0x4] sm:$0xf] }
 0x646   : > { %1669 = vadd.xlane.f32.xlu2 %v1665_v0 }
 0x649   : > { %v1662_v1 = vpop.f32.mrf.mxu1 }
 0x64a   : > { %v1663_v2 = vadd.f32 %v3203_v61, %v1662_v1  ;;  %v2746_v61 = vld [vmem:[%s4162_s25] sm:$0xf] }
 0x64b   : > { %v2747_v1 = vor.u32 %v2977_v62, %v2746_v61 }
 0x64c   : > { %v1666_v3 = vadd.f32 %v1663_v2, %v4241_v29  ;;  %v2748_v2 = vld [vmem:[%s4162_s25 + $0x8] sm:$0xf0] }
 0x64d   : > { %v2751_v4 = vor.u32 %v2976_v63, %v2748_v2  ;;  %1836 = vmatpush.bf16.msrb.mxu2 %v2747_v1 }
 0x64e   : > { %1671 = vadd.xlane.f32.xlu0 %v1666_v3 }
 0x64f   : > { %1850 = vmatpush.bf16.msra.mxu3 %v2751_v4 }
 0x6b9   : > { %v1670_v28 = vpop.xlane.xlu2 %1669 }
 0x6ba   : > { %v1680_v11 = vmul.f32 %v4324_v10, %v1670_v28 }
 0x6bc   : > { %v4327_v12 = vsub.f32 %v1665_v0, %v1680_v11 }
 0x6be   : > { %v1684_v29 = vmul.f32 %v4327_v12, %v4327_v12 }
 0x6c0   : > { %1686 = vadd.xlane.f32.xlu1 %v1684_v29 }
 0x6c1   : > { %v1672_v13 = vpop.xlane.xlu0 %1671 }
 0x6c2   : > { %v1681_v14 = vmul.f32 %v4324_v10, %v1672_v13 }
 0x6c4   : > { %v4332_v15 = vsub.f32 %v1666_v3, %v1681_v14 }
 0x6c6   : > { %v1685_v16 = vmul.f32 %v4332_v15, %v4332_v15 }
 0x6c8   : > { %1688 = vadd.xlane.f32.xlu2 %v1685_v16 }
 0x733   : > { %v1687_v0 = vpop.xlane.xlu1 %1686 }
 0x734   : > { %v1690_v3 = vmul.f32 %v1687_v0, %v4324_v10 }
 0x736   : > { %v1692_v5 = vadd.f32 1e-12, %v1690_v3 }
 0x738   : > { %3227 = vrsqrt.f32 %v1692_v5  ;;  %vm1700_vm12 = vweird.f32 %v1692_v5 }
 0x73b   : > { %v1689_v6 = vpop.xlane.xlu2 %1688 }
 0x73c   : > { %v1691_v7 = vmul.f32 %v1689_v6, %v4324_v10 }
 0x73e   : > { %v3228_v8 = vpop.eup %3227  ;;  %v1693_v9 = vadd.f32 1e-12, %v1691_v7 }
 0x73f   : > { %v1695_v28 = vmul.f32 %v3228_v8, %v1692_v5  ;;  %vm1701_vm11 = vweird.f32 %v3228_v8 }
 0x740   : > { %3229 = vrsqrt.f32 %v1693_v9  ;;  %vm1702_vm13 = vmor %vm1700_vm12, %vm1701_vm11  ;;  %vm1710_vm15 = vweird.f32 %v1693_v9 }
 0x741   : > { %v1696_v11 = vmul.f32 %v3228_v8, %v1695_v28 }
 0x743   : > { %v1697_v29 = vmul.f32 0.5, %v1696_v11 }
 0x745   : > { %v1698_v13 = vsub.f32 1.5, %v1697_v29 }
 0x746   : > { %v3230_v14 = vpop.eup %3229 }
 0x747   : > { %v1699_v16 = vmul.f32 %v3228_v8, %v1698_v13  ;;  %v1705_v17 = vmul.f32 %v3230_v14, %v1693_v9  ;;  %vm1711_vm14 = vweird.f32 %v3230_v14 }
 0x748   : > { %vm1712_vm0 = vmor %vm1710_vm15, %vm1711_vm14 }
 0x749   : > { %v1706_v18 = vmul.f32 %v3230_v14, %v1705_v17  ;;  %v1703_v19 = vsel %vm1702_vm13, %v3228_v8, %v1699_v16 }
 0x74a   : > { %v1714_v22 = vmul.f32 %v1703_v19, %v4327_v12  ;;  %v3205_v12 = vld [vmem:[%s1029_s4] ss:$0 sm:$0xff] }
 0x74b   : > { %v1707_v20 = vmul.f32 0.5, %v1706_v18 }
 0x74c   : > { %v1719_v27 = vmul.f32 %v3204_v23, %v1714_v22 }
 0x74d   : > { %v1708_v21 = vsub.f32 1.5, %v1707_v20 }
 0x74e   : > { %v4382_v31 = vadd.f32 %v3205_v12, %v1719_v27 }
 0x74f   : > { %v1709_v24 = vmul.f32 %v3230_v14, %v1708_v21 }
 0x751   : > { %v1713_v25 = vsel %vm1712_vm0, %v3230_v14, %v1709_v24 }
 0x752   : > { %v1715_v26 = vmul.f32 %v1713_v25, %v4332_v15  ;;  %v2999_v15 = vld [vmem:[%s4166_s0 + $0x38] sm:$0xff] }
 0x753   : > { %2027 = vmatpush.bf16.msrb.mxu0 %v2999_v15 }
 0x754   : > { %v1720_v30 = vmul.f32 %v3204_v23, %v1715_v26 }
 0x756   : > { %v4384_v33 = vadd.f32 %v3205_v12, %v1720_v30 }
 0x757   : > { %2028 = vmatpush.bf16.msrb.mxu0 %v2998_v36 }
 0x758   : > { %v1726_v34 = vpack.c.bf16 %v4384_v33, %v4382_v31 }
 0x75a   : > { %1837 = vmatmul.bf16.vlgmr.msrb.gmra.mxu2 %v1726_v34  ;;  %1851 = vmatmul.bf16.vlgmr.msra.gmra.mxu3 %v1726_v34 }
 0x75b   : > { %2029 = vmatpush.bf16.msrb.mxu0 %v2997_v38  ;;  %v3206_v38 = vld [vmem:[%s4541_s26] ss:$0 sm:$0xff] }
 0x75f   : > { %2030 = vmatpush.bf16.msrb.mxu0 %v2996_v40 }
 0x763   : > { %2031 = vmatpush.bf16.msrb.mxu0 %v2995_v42 }
 0x767   : > { %2032 = vmatpush.bf16.msrb.mxu0 %v2994_v44 }
 0x76b   : > { %2033 = vmatpush.bf16.msrb.mxu0 %v2993_v46 }
 0x76f   : > { %2034 = vmatpush.bf16.msrb.mxu0 %v2992_v52 }
 0x7dd   : > { %v1838_v50 = vpop.f32.mrf.mxu2  ;;  %v1852_v51 = vpop.f32.mrf.mxu3 }
 0x7de   : > { %v1839_v54 = vadd.f32 %v1838_v50, %v1745_v48  ;;  %v1853_v55 = vadd.f32 %v1852_v51, %v1746_v49 }
 0x7e0   : > { %v1857_v56 = vmul.f32 %v1839_v54, %v1839_v54  ;;  %v1858_v57 = vmul.f32 %v1853_v55, %v1853_v55 }
 0x7e2   : > { %v1861_v58 = vmul.f32 %v1857_v56, %v1839_v54  ;;  %v1862_v59 = vmul.f32 %v1858_v57, %v1853_v55 }
 0x7e4   : > { %v1865_v60 = vmul.f32 0.044715, %v1861_v58  ;;  %v1866_v61 = vmul.f32 0.044715, %v1862_v59 }
 0x7e5   : > { %v1840_v62 = vpop.f32.mrf.mxu2  ;;  %v1854_v63 = vpop.f32.mrf.mxu3 }
 0x7e6   : > { %v1869_v0 = vadd.f32 %v1865_v60, %v1839_v54  ;;  %v1870_v1 = vadd.f32 %v1866_v61, %v1853_v55  ;;  %v1841_v2 = vadd.f32 %v1840_v62, %v1745_v48  ;;  %v1855_v3 = vadd.f32 %v1854_v63, %v1746_v49 }
 0x7e8   : > { %v1873_v4 = vmul.f32 0.7978846, %v1869_v0  ;;  %v1859_v5 = vmul.f32 %v1841_v2, %v1841_v2  ;;  %v1860_v6 = vmul.f32 %v1855_v3, %v1855_v3  ;;  %v1874_v7 = vmul.f32 0.7978846, %v1870_v1 }
 0x7ea   : > { %v1863_v8 = vmul.f32 %v1859_v5, %v1841_v2  ;;  %v1864_v9 = vmul.f32 %v1860_v6, %v1855_v3  ;;  %3231 = vtanh.f32 %v1873_v4  ;;  %v3207_v4 = vld [vmem:[%s1032_s10] ss:$0 sm:$0xff]  ;;  %s4544_s10 = sld [smem:[#allocation33_spill]] }
 0x7eb   : > { %3233 = vtanh.f32 %v1874_v7  ;;  %v3208_v6 = vld [vmem:[%s1035_s22] ss:$0 sm:$0xff] }
 0x7ec   : > { %v1867_v28 = vmul.f32 0.044715, %v1863_v8  ;;  %v1868_v11 = vmul.f32 0.044715, %v1864_v9 }
 0x7ee   : > { %v1871_v29 = vadd.f32 %v1867_v28, %v1841_v2  ;;  %v1872_v13 = vadd.f32 %v1868_v11, %v1855_v3 }
 0x7f0   : > { %v1875_v14 = vmul.f32 0.7978846, %v1871_v29  ;;  %v1876_v16 = vmul.f32 0.7978846, %v1872_v13  ;;  %v3232_v17 = vpop.eup %3231  ;;  %p2872_p1 = scmp.ne.s32.totalorder %s4544_s10, 1 }
 0x7f1   : > { %v3234_v18 = vpop.eup %3233  ;;  %v1881_v19 = vadd.f32 1.0, %v3232_v17  ;;  %s4545_s28 = sld [smem:[#allocation53_spill]] (!%p2872_p1) }
 0x7f2   : > { %3235 = vtanh.f32 %v1875_v14  ;;  %v1882_v20 = vadd.f32 1.0, %v3234_v18 }
 0x7f3   : > { %3237 = vtanh.f32 %v1876_v16  ;;  %v1885_v23 = vmul.f32 0.5, %v1881_v19 }
 0x7f4   : > { %v1886_v25 = vmul.f32 0.5, %v1882_v20 }
 0x7f5   : > { %v1889_v30 = vmul.f32 %v1885_v23, %v1839_v54 }
 0x7f6   : > { %v1890_v15 = vmul.f32 %v1886_v25, %v1853_v55 }
 0x7f8   : > { %v3236_v21 = vpop.eup %3235 }
 0x7f9   : > { %v3238_v22 = vpop.eup %3237  ;;  %v1883_v24 = vadd.f32 1.0, %v3236_v21 }
 0x7fa   : > { %v1884_v26 = vadd.f32 1.0, %v3238_v22 }
 0x7fb   : > { %v1887_v27 = vmul.f32 0.5, %v1883_v24 }
 0x7fc   : > { %v1888_v12 = vmul.f32 0.5, %v1884_v26 }
 0x7fd   : > { %v1891_v34 = vmul.f32 %v1887_v27, %v1841_v2 }
 0x7fe   : > { %v1892_v35 = vmul.f32 %v1888_v12, %v1855_v3 }
 0x7ff   : > { %v1893_v36 = vpack.c.bf16 %v1891_v34, %v1889_v30 }
 0x800   : > { %v1894_v37 = vpack.c.bf16 %v1892_v35, %v1890_v15 }
 0x801   : > { %2035 = vmatmul.bf16.vlgmr.msrb.gmra.mxu0 %v1893_v36 }
 0x802   : > { %2049 = vmatmul.bf16.vlgmr.msra.gmra.mxu1 %v1894_v37 }
 0x87e   : > { %v2036_v39 = vpop.f32.mrf.mxu0 }
 0x87f   : > { %v2037_v40 = vadd.f32 %v3206_v38, %v2036_v39  ;;  %v2050_v41 = vpop.f32.mrf.mxu1 }
 0x881   : > { %v2051_v42 = vadd.f32 %v2050_v41, %v2037_v40 }
 0x883   : > { %v2055_v43 = vadd.f32 %v2051_v42, %v4382_v31 }
 0x885   : > { %2059 = vadd.xlane.f32.xlu0 %v2055_v43 }
 0x886   : > { %v2038_v44 = vpop.f32.mrf.mxu0 }
 0x887   : > { %v2039_v45 = vadd.f32 %v3206_v38, %v2038_v44  ;;  %v2052_v32 = vpop.f32.mrf.mxu1 }
 0x889   : > { %v2053_v46 = vadd.f32 %v2052_v32, %v2039_v45 }
 0x88b   : > { %v2056_v47 = vadd.f32 %v2053_v46, %v4384_v33 }
 0x88d   : > { %2061 = vadd.xlane.f32.xlu2 %v2056_v47 }
 0x8f8   : > { %v2060_v48 = vpop.xlane.xlu0 %2059 }
 0x8f9   : > { %v2063_v49 = vmul.f32 %v2060_v48, %v4324_v10 }
 0x8fb   : > { %v2065_v50 = vsub.f32 %v2055_v43, %v2063_v49 }
 0x8fd   : > { %v2067_v51 = vmul.f32 %v2065_v50, %v2065_v50 }
 0x8ff   : > { %2069 = vadd.xlane.f32.xlu1 %v2067_v51 }
 0x900   : > { %v2062_v52 = vpop.xlane.xlu2 %2061 }
 0x901   : > { %v2064_v53 = vmul.f32 %v2062_v52, %v4324_v10 }
 0x903   : > { %v2066_v54 = vsub.f32 %v2056_v47, %v2064_v53 }
 0x905   : > { %v2068_v55 = vmul.f32 %v2066_v54, %v2066_v54 }
 0x907   : > { %2071 = vadd.xlane.f32.xlu0 %v2068_v55 }
 0x972   : > { %v2070_v31 = vpop.xlane.xlu1 %2069 }
 0x973   : > { %v2073_v56 = vmul.f32 %v2070_v31, %v4324_v10 }
 0x975   : > { %v2075_v57 = vadd.f32 1e-12, %v2073_v56 }
 0x977   : > { %3239 = vrsqrt.f32 %v2075_v57  ;;  %vm2083_vm2 = vweird.f32 %v2075_v57 }
 0x97a   : > { %v2072_v33 = vpop.xlane.xlu0 %2071 }
 0x97b   : > { %v2074_v58 = vmul.f32 %v2072_v33, %v4324_v10 }
 0x97d   : > { %v3240_v59 = vpop.eup %3239  ;;  %v2076_v60 = vadd.f32 1e-12, %v2074_v58 }
 0x97e   : > { %v2078_v61 = vmul.f32 %v3240_v59, %v2075_v57  ;;  %vm2084_vm1 = vweird.f32 %v3240_v59 }
 0x97f   : > { %3241 = vrsqrt.f32 %v2076_v60  ;;  %vm2085_vm3 = vmor %vm2083_vm2, %vm2084_vm1  ;;  %vm2093_vm5 = vweird.f32 %v2076_v60 }
 0x980   : > { %v2079_v62 = vmul.f32 %v3240_v59, %v2078_v61 }
 0x982   : > { %v2080_v63 = vmul.f32 0.5, %v2079_v62 }
 0x984   : > { %v2081_v0 = vsub.f32 1.5, %v2080_v63 }
 0x985   : > { %v3242_v1 = vpop.eup %3241 }
 0x986   : > { %v2082_v2 = vmul.f32 %v3240_v59, %v2081_v0  ;;  %v2088_v3 = vmul.f32 %v3242_v1, %v2076_v60  ;;  %vm2094_vm4 = vweird.f32 %v3242_v1 }
 0x987   : > { %vm2095_vm6 = vmor %vm2093_vm5, %vm2094_vm4 }
 0x988   : > { %v2086_v10 = vsel %vm2085_vm3, %v3240_v59, %v2082_v2  ;;  %v2089_v5 = vmul.f32 %v3242_v1, %v2088_v3 }
 0x989   : > { %v2097_v7 = vmul.f32 %v2086_v10, %v2065_v50 }
 0x98a   : > { %v2090_v8 = vmul.f32 0.5, %v2089_v5 }
 0x98b   : > { %v2102_v9 = vmul.f32 %v3207_v4, %v2097_v7 }
 0x98c   : > { %v2091_v28 = vsub.f32 1.5, %v2090_v8 }
 0x98d   : > { %v2107_v11 = vadd.f32 %v3208_v6, %v2102_v9 }
 0x98e   : > { %v2092_v29 = vmul.f32 %v3242_v1, %v2091_v28 }
 0x98f   : > { %2109 = vst [vmem:[#allocation2] sm:$0xff] %v2107_v11 }
 0x990   : > { %v2096_v13 = vsel %vm2095_vm6, %v3242_v1, %v2092_v29 }
 0x991   : > { %v2098_v14 = vmul.f32 %v2096_v13, %v2066_v54 }
 0x993   : > { %v2103_v16 = vmul.f32 %v3207_v4, %v2098_v14  ;;  %2114 = sbr.rel (%p2872_p1) target bundleno = 2761 (0xac9), region = 164 }
 0x995   : > { %v2108_v17 = vadd.f32 %v3208_v6, %v2103_v16 }
 0x997   : > { %2110 = vst [vmem:[#allocation2 + $0x8] sm:$0xff] %v2108_v17 }
 0x998   : > { %v3015_v18 = vld [vmem:[#allocation18 + $0x38] sm:$0xff]  ;;  %v3014_v19 = vld [vmem:[#allocation18 + $0x30] sm:$0xff]  ;;  %v3013_v22 = vld [vmem:[#allocation18 + $0x28] sm:$0xff]  ;;  %v2116_v34 = vrot.slane %v2108_v17, 7  ;;  %vm2118_vm7 = vcmask 1040384  }
 0x999   : > { %2189 = vmatpush.bf16.msra.mxu0 %v3015_v18  ;;  %v3023_v20 = vld [vmem:[#allocation19 + $0x38] sm:$0xff]  ;;  %v3022_v21 = vld [vmem:[#allocation19 + $0x30] sm:$0xff]  ;;  %v3021_v23 = vld [vmem:[#allocation19 + $0x28] sm:$0xff] }
 0x99a   : > { %2272 = vmatpush.bf16.msra.mxu1 %v3023_v20  ;;  %v3012_v24 = vld [vmem:[#allocation18 + $0x20] sm:$0xff]  ;;  %v3011_v26 = vld [vmem:[#allocation18 + $0x18] sm:$0xff]  ;;  %v3010_v12 = vld [vmem:[#allocation18 + $0x10] sm:$0xff]  ;;  %v2119_v35 = vsel %vm2118_vm7, %v2107_v11, %v2116_v34 }
 0x99b   : > { %v3020_v25 = vld [vmem:[#allocation19 + $0x20] sm:$0xff]  ;;  %v3019_v27 = vld [vmem:[#allocation19 + $0x18] sm:$0xff]  ;;  %v3009_v30 = vld [vmem:[#allocation18 + $0x8] sm:$0xff]  ;;  %v2120_v36 = vpack.c.bf16 %v2119_v35, %v2119_v35 }
 0x99c   : > { %v3008_v15 = vld [vmem:[#allocation18] sm:$0xff]  ;;  %v3018_v37 = vld [vmem:[#allocation19 + $0x10] sm:$0xff]  ;;  %v3017_v38 = vld [vmem:[#allocation19 + $0x8] sm:$0xff] }
 0x99d   : > { %2190 = vmatpush.bf16.msra.mxu0 %v3014_v19  ;;  %v3016_v39 = vld [vmem:[#allocation19] sm:$0xff]  ;;  %v3243_v40 = vld [vmem:[%s4545_s28] ss:$0 sm:$0xff] }
 0x99e   : > { %2273 = vmatpush.bf16.msra.mxu1 %v3022_v21  ;;  %v3244_v32 = vld [vmem:[#allocation20] ss:$0 sm:$0xff] }
 0x9a1   : > { %2191 = vmatpush.bf16.msra.mxu0 %v3013_v22 }
 0x9a2   : > { %2274 = vmatpush.bf16.msra.mxu1 %v3021_v23 }
 0x9a5   : > { %2192 = vmatpush.bf16.msra.mxu0 %v3012_v24 }
 0x9a6   : > { %2275 = vmatpush.bf16.msra.mxu1 %v3020_v25 }
 0x9a9   : > { %2193 = vmatpush.bf16.msra.mxu0 %v3011_v26 }
 0x9aa   : > { %2276 = vmatpush.bf16.msra.mxu1 %v3019_v27 }
 0x9ad   : > { %2194 = vmatpush.bf16.msra.mxu0 %v3010_v12 }
 0x9ae   : > { %2277 = vmatpush.bf16.msra.mxu1 %v3018_v37 }
 0x9b1   : > { %2195 = vmatpush.bf16.msra.mxu0 %v3009_v30 }
 0x9b2   : > { %2278 = vmatpush.bf16.msra.mxu1 %v3017_v38 }
 0x9b5   : > { %2196 = vmatpush.bf16.msra.mxu0 %v3008_v15 }
 0x9b6   : > { %2279 = vmatpush.bf16.msra.mxu1 %v3016_v39 }
 0x9b8   : > { %2197 = vmatmul.bf16.vlgmr.msra.gmra.mxu0 %v2120_v36 }
 0xa35   : > { %v2198_v41 = vpop.f32.mrf.mxu0 }
 0xa36   : > { %v2199_v42 = vadd.f32 %v3243_v40, %v2198_v41 }
 0xa38   : > { %3245 = vtanh.f32 %v2199_v42 }
 0xa3d   : > { %v2200_v43 = vpop.f32.mrf.mxu0 }
 0xa3e   : > { %v3246_v44 = vpop.eup %3245 }
 0xa3f   : > { %v2203_v45 = vpack.c.bf16 %v3246_v44, %v3246_v44 }
 0xa41   : > { %2280 = vmatmul.bf16.vlgmr.msra.gmra.mxu1 %v2203_v45 }
 0xabe   : > { %v2281_v46 = vpop.f32.mrf.mxu1 }
 0xabf   : > { %v2282_v47 = vadd.f32 %v3244_v32, %v2281_v46 }
 0xac1   : > { %3247 = vtanh.f32 %v2282_v47 }
 0xac6   : > { %v2283_v48 = vpop.f32.mrf.mxu1 }
 0xac7   : > { %v3248_v49 = vpop.eup %3247 }
 0xac8   : > { %2286 = vst [vmem:[#allocation22] sm:$0x3] %v3248_v49 }
 0xac9 PF: > { %s4546_s23 = sld [smem:[#allocation33_spill]]  ;;  %s3779_s4 = smov [#allocation22]  }
 0xaca   : > { %s2293_s8 = sshll.u32 %s3779_s4, 4  ;;  %s4547_s22 = sld [smem:[#allocation54_spill]]  ;;  %s2294_s8 = int_to_ptr.vmem [resolvable:$true] %s2293_s8 }
 0xacf   : > { %p3135_p3 = scmp.eq.s32.totalorder %s4546_s23, 1 }
 0xad0   : > { %s2295_s11 = sshll.u32 %s4547_s22, 4  ;;  %s2296_s11 = int_to_ptr.hbm [resolvable:$true] %s2295_s11 }
 0xad1   : > { %3073 = dma.vmem_to_hbm [thread:$0]  (%p3135_p3), %s2294_s8, 32, %s2296_s11, [#allocation5]  }
 0xad2   : > { %3742 = dma.done.wait (%p3135_p3), [#allocation5], 32  }
 0xad3   : > { %3744 = vsyncadd (%p3135_p3), [#allocation5], 4294967264 }
 0xad4 PF: > { %s4548_s24 = sld [smem:[#allocation35_spill]] }
 0xad5   : > { %s4549_s1 = sld [smem:[#allocation31_spill]] }
 0xad6   : > { %s4550_s22 = sld [smem:[#allocation32_spill]] }
 0xad7   : > { %s4551_s23 = sld [smem:[#allocation36_spill]] }
 0xada   : > { %p32_p12 = scmp.ge.s32.totalorder %s4548_s24, 4  }
 0xadc   :  { %34 = sbr.rel (!%p32_p12) target bundleno = 24 (0x18), region = 253 }
 0xae1   :  { %2309 = vsyncpa [#allocation4], 1 }
 0xae2   :  { %2311 = vsyncpa [#allocation4 + $0x1], 1 }
 0xae3   :  { %2312 = vsyncpa [#allocation7], 1 }
 0xae4   :  { %2313 = vsyncpa [#allocation10], 1 }
 0xae5   :  { %2314 = vsyncpa [#allocation21], 1 }
 0xae6   :  { %2315 = vsyncpa [#allocation5], 1 }
 0xae7   :  { %2317 = vsyncpa [#allocation5 + $0x1], 1 }

</bundles_post_ra>
